<compile_context>
chip_gen: v7x
topology: tpu7x:2x2x1
jax: 0.10.0
libtpu: 0.0.40
codegen_flags: <defaults>
</compile_context>

<pallas_src>
import math

import jax
import jax.numpy as jnp
from jax.experimental import pallas as pl
from jax.experimental.pallas import tpu as pltpu

IMGSIZE = 64
LATENT_DIMS = 5
HIDDEN = 30
IMG_FLAT = IMGSIZE * IMGSIZE  # 4096

TB_MAX = 256  # batch tile (safe on v5e/v6e/v7x with the 48 MiB VMEM limit below)


def autoencoder_kernel(x_ref,
                       w1e_ref, b1e_ref,
                       wmid_ref, bmid_ref,
                       w2d_ref, b2d_ref,
                       out_ref):
    """One batch tile of the fused encoder+decoder forward pass.

    x_ref: (TB, 4096) bf16; weights/biases are full-array VMEM-resident blocks.
    """
    x = x_ref[...]

    # Encoder layer 1: relu(x @ W1e + b1e)   (bf16 MXU, f32 accumulate)
    h = jnp.dot(x, w1e_ref[...], preferred_element_type=jnp.float32) + b1e_ref[...]
    h = jnp.maximum(h, 0.0)

    # Folded encoder.linear2 + decoder.linear1 (no nonlinearity between them):
    # relu(h @ (W2e @ W1d) + (b2e @ W1d + b1d))   -- single 30x30 f32 matmul.
    h2 = jnp.dot(h, wmid_ref[...], preferred_element_type=jnp.float32) + bmid_ref[...]
    h2 = jnp.maximum(h2, 0.0)

    # Decoder layer 2: sigmoid(h2 @ W2d + b2d)   (bf16 MXU, f32 accumulate)
    logits = jnp.dot(h2.astype(jnp.bfloat16), w2d_ref[...],
                     preferred_element_type=jnp.float32) + b2d_ref[...]
    out_ref[...] = jax.nn.sigmoid(logits)


def autoencoder_forward(x, params):
    """x: (B, IMG_FLAT) float32 -> (B, 1, IMGSIZE, IMGSIZE) float32."""
    (w1e, b1e), (w2e, b2e), (w1d, b1d), (w2d, b2d) = params
    B = x.shape[0]

    # Fold the tiny middle layers (30 -> 5 -> 30, purely affine) into one map.
    w_mid = w2e @ w1d                  # (30, 30) f32
    b_mid = b2e @ w1d + b1d            # (1, 30)  f32

    # bf16 on the bandwidth-heavy operands; biases / small mats stay f32.
    x_bf = x.astype(jnp.bfloat16)
    w1e_bf = w1e.astype(jnp.bfloat16)
    w2d_bf = w2d.astype(jnp.bfloat16)

    # Batch tile: multiple of 8, capped at TB_MAX; pad B up to a whole tile.
    tb = min(TB_MAX, 8 * pl.cdiv(B, 8))
    b_pad = tb * pl.cdiv(B, tb)
    if b_pad != B:
        x_bf = jnp.pad(x_bf, ((0, b_pad - B), (0, 0)))

    tile_map = lambda i: (i, 0)   # x / out: walk the batch axis
    rep_map = lambda i: (0, 0)    # weights / biases: resident across the grid

    cost = pl.CostEstimate(
        flops=2 * b_pad * (2 * IMG_FLAT * HIDDEN + HIDDEN * HIDDEN),
        transcendentals=b_pad * IMG_FLAT,  # sigmoid
        bytes_accessed=(b_pad * IMG_FLAT * (2 + 4)              # x in (bf16) + out (f32)
                        + 2 * (w1e_bf.size + w2d_bf.size)       # bf16 weights
                        + 4 * (w_mid.size + b_mid.size + b1e.size + b2d.size)),
    )

    out_flat = pl.pallas_call(
        autoencoder_kernel,
        out_shape=jax.ShapeDtypeStruct((b_pad, IMG_FLAT), jnp.float32),
        grid=(b_pad // tb,),
        in_specs=[
            pl.BlockSpec((tb, IMG_FLAT), tile_map),
            pl.BlockSpec((IMG_FLAT, HIDDEN), rep_map),
            pl.BlockSpec((1, HIDDEN), rep_map),
            pl.BlockSpec((HIDDEN, HIDDEN), rep_map),
            pl.BlockSpec((1, HIDDEN), rep_map),
            pl.BlockSpec((HIDDEN, IMG_FLAT), rep_map),
            pl.BlockSpec((1, IMG_FLAT), rep_map),
        ],
        out_specs=pl.BlockSpec((tb, IMG_FLAT), tile_map),
        compiler_params=pltpu.CompilerParams(
            dimension_semantics=("parallel",),
            vmem_limit_bytes=48 * 1024 * 1024,
        ),
        cost_estimate=cost,
    )(x_bf, w1e_bf, b1e, w_mid, b_mid, w2d_bf, b2d)

    # PyTorch: z.reshape((-1, 1, IMGSIZE, IMGSIZE)); drop batch padding first.
    return out_flat[:B].reshape(-1, 1, IMGSIZE, IMGSIZE)


def init_linear(key, fan_in, fan_out):
    """Deterministic init matching PyTorch nn.Linear default: U(+-1/sqrt(fan_in))."""
    kw, kb = jax.random.split(key)
    bound = 1.0 / math.sqrt(fan_in)
    w = jax.random.uniform(kw, (fan_in, fan_out), jnp.float32, -bound, bound)
    b = jax.random.uniform(kb, (1, fan_out), jnp.float32, -bound, bound)
    return w, b


def init_params(key):
    k1, k2, k3, k4 = jax.random.split(key, 4)
    return (
        init_linear(k1, IMG_FLAT, HIDDEN),     # encoder.linear1
        init_linear(k2, HIDDEN, LATENT_DIMS),  # encoder.linear2
        init_linear(k3, LATENT_DIMS, HIDDEN),  # decoder.linear1
        init_linear(k4, HIDDEN, IMG_FLAT),     # decoder.linear2
    )


def reference_forward(x, params):
    """Pure-JAX f32 reference of the PyTorch module."""
    (w1e, b1e), (w2e, b2e), (w1d, b1d), (w2d, b2d) = params
    h = jnp.maximum(x @ w1e + b1e, 0.0)
    z = h @ w2e + b2e
    h2 = jnp.maximum(z @ w1d + b1d, 0.0)
    out = jax.nn.sigmoid(h2 @ w2d + b2d)
    return out.reshape(-1, 1, IMGSIZE, IMGSIZE)


if __name__ == "__main__":
    key = jax.random.PRNGKey(0)
    kx, kp = jax.random.split(key)

    B = 8
    x = jax.random.normal(kx, (B, IMG_FLAT), dtype=jnp.float32)
    params = init_params(kp)

    out = autoencoder_forward(x, params)
    out = jax.block_until_ready(out)

    ref = reference_forward(x, params)
    assert out.shape == (B, 1, IMGSIZE, IMGSIZE), out.shape
    # bf16 activations/weights in the kernel vs f32 reference -> relaxed tolerance.
    assert jnp.allclose(out, ref, atol=2e-2, rtol=0.0), "mismatch vs JAX reference"

    print("KERNEL_OK")
</pallas_src>

<mosaic_0001>
module attributes {stable_mosaic.version = 11 : i64} {
  func.func @autoencoder_kernel(%arg0: i32, %arg1: memref<8x4096xbf16, #tpu.memory_space<vmem>>, %arg2: memref<4096x30xbf16, #tpu.memory_space<vmem>>, %arg3: memref<1x30xf32, #tpu.memory_space<vmem>>, %arg4: memref<30x30xf32, #tpu.memory_space<vmem>>, %arg5: memref<1x30xf32, #tpu.memory_space<vmem>>, %arg6: memref<30x4096xbf16, #tpu.memory_space<vmem>>, %arg7: memref<1x4096xf32, #tpu.memory_space<vmem>>, %arg8: memref<8x4096xf32, #tpu.memory_space<vmem>>) attributes {dimension_semantics = [#tpu.dimension_semantics<parallel>], iteration_bounds = array<i64: 1>, scalar_prefetch = 0 : i64, scratch_operands = 0 : i64, tpu.core_type = #tpu.core_type<tc>, window_params = [{transform_indices = @transform_0, window_bounds = array<i64: 8, 4096>}, {pipeline_mode = #tpu.pipeline_mode<synchronous>, transform_indices = @transform_1, window_bounds = array<i64: 4096, 30>}, {pipeline_mode = #tpu.pipeline_mode<synchronous>, transform_indices = @transform_2, window_bounds = array<i64: 1, 30>}, {pipeline_mode = #tpu.pipeline_mode<synchronous>, transform_indices = @transform_3, window_bounds = array<i64: 30, 30>}, {pipeline_mode = #tpu.pipeline_mode<synchronous>, transform_indices = @transform_4, window_bounds = array<i64: 1, 30>}, {pipeline_mode = #tpu.pipeline_mode<synchronous>, transform_indices = @transform_5, window_bounds = array<i64: 30, 4096>}, {pipeline_mode = #tpu.pipeline_mode<synchronous>, transform_indices = @transform_6, window_bounds = array<i64: 1, 4096>}, {transform_indices = @transform_7, window_bounds = array<i64: 8, 4096>}]} {
    %c0 = arith.constant 0 : index
    %c0_0 = arith.constant 0 : index
    %0 = vector.load %arg1[%c0, %c0_0] : memref<8x4096xbf16, #tpu.memory_space<vmem>>, vector<8x4096xbf16>
    %c0_1 = arith.constant 0 : index
    %c0_2 = arith.constant 0 : index
    %1 = vector.load %arg2[%c0_1, %c0_2] : memref<4096x30xbf16, #tpu.memory_space<vmem>>, vector<4096x30xbf16>
    %cst = arith.constant dense<0.000000e+00> : vector<8x30xf32>
    %2 = tpu.matmul %0, %1, %cst {dimension_numbers = #tpu.dot_dimension_numbers<[1], [0], [0], [1], [0, 0, 1, 1], [], []>} : vector<8x4096xbf16>, vector<4096x30xbf16>, vector<8x30xf32> -> vector<8x30xf32>
    %c0_3 = arith.constant 0 : index
    %c0_4 = arith.constant 0 : index
    %3 = vector.load %arg3[%c0_3, %c0_4] : memref<1x30xf32, #tpu.memory_space<vmem>>, vector<1x30xf32>
    %4 = vector.broadcast %3 : vector<1x30xf32> to vector<8x30xf32>
    %5 = arith.addf %2, %4 : vector<8x30xf32>
    %cst_5 = arith.constant 0.000000e+00 : f32
    %6 = vector.broadcast %cst_5 : f32 to vector<8x30xf32>
    %7 = arith.maximumf %5, %6 : vector<8x30xf32>
    %c0_6 = arith.constant 0 : index
    %c0_7 = arith.constant 0 : index
    %8 = vector.load %arg4[%c0_6, %c0_7] : memref<30x30xf32, #tpu.memory_space<vmem>>, vector<30x30xf32>
    %cst_8 = arith.constant dense<0.000000e+00> : vector<8x30xf32>
    %9 = tpu.matmul %7, %8, %cst_8 {dimension_numbers = #tpu.dot_dimension_numbers<[1], [0], [0], [1], [0, 0, 1, 1], [], []>} : vector<8x30xf32>, vector<30x30xf32>, vector<8x30xf32> -> vector<8x30xf32>
    %c0_9 = arith.constant 0 : index
    %c0_10 = arith.constant 0 : index
    %10 = vector.load %arg5[%c0_9, %c0_10] : memref<1x30xf32, #tpu.memory_space<vmem>>, vector<1x30xf32>
    %11 = vector.broadcast %10 : vector<1x30xf32> to vector<8x30xf32>
    %12 = arith.addf %9, %11 : vector<8x30xf32>
    %cst_11 = arith.constant 0.000000e+00 : f32
    %13 = vector.broadcast %cst_11 : f32 to vector<8x30xf32>
    %14 = arith.maximumf %12, %13 : vector<8x30xf32>
    %15 = arith.truncf %14 : vector<8x30xf32> to vector<8x30xbf16>
    %c0_12 = arith.constant 0 : index
    %c0_13 = arith.constant 0 : index
    %16 = vector.load %arg6[%c0_12, %c0_13] : memref<30x4096xbf16, #tpu.memory_space<vmem>>, vector<30x4096xbf16>
    %cst_14 = arith.constant dense<0.000000e+00> : vector<8x4096xf32>
    %17 = tpu.matmul %15, %16, %cst_14 {dimension_numbers = #tpu.dot_dimension_numbers<[1], [0], [0], [1], [0, 0, 1, 1], [], []>} : vector<8x30xbf16>, vector<30x4096xbf16>, vector<8x4096xf32> -> vector<8x4096xf32>
    %c0_15 = arith.constant 0 : index
    %c0_16 = arith.constant 0 : index
    %18 = vector.load %arg7[%c0_15, %c0_16] : memref<1x4096xf32, #tpu.memory_space<vmem>>, vector<1x4096xf32>
    %19 = vector.broadcast %18 : vector<1x4096xf32> to vector<8x4096xf32>
    %20 = arith.addf %17, %19 : vector<8x4096xf32>
    %21 = arith.negf %20 : vector<8x4096xf32>
    %22 = math.exp %21 : vector<8x4096xf32>
    %cst_17 = arith.constant 1.000000e+00 : f32
    %23 = vector.broadcast %cst_17 : f32 to vector<8x4096xf32>
    %24 = arith.addf %23, %22 : vector<8x4096xf32>
    %25 = arith.divf %23, %24 : vector<8x4096xf32>
    %c0_18 = arith.constant 0 : index
    %c0_19 = arith.constant 0 : index
    %26 = vector.load %arg8[%c0_18, %c0_19] : memref<8x4096xf32, #tpu.memory_space<vmem>>, vector<8x4096xf32>
    tpu.vector_store %arg8[%c0_18, %c0_19], %25 {strides = array<i32>} : memref<8x4096xf32, #tpu.memory_space<vmem>>, vector<8x4096xf32>,
    return
  }
  func.func @transform_0(%arg0: i32) -> (i32, i32) {
    %c0_i32 = arith.constant 0 : i32
    %c0_i32_0 = arith.constant 0 : i32
    return %arg0, %c0_i32 : i32, i32
  }
  func.func @transform_1(%arg0: i32) -> (i32, i32) {
    %c0_i32 = arith.constant 0 : i32
    %c0_i32_0 = arith.constant 0 : i32
    %c0_i32_1 = arith.constant 0 : i32
    return %c0_i32, %c0_i32_0 : i32, i32
  }
  func.func @transform_2(%arg0: i32) -> (i32, i32) {
    %c0_i32 = arith.constant 0 : i32
    %c0_i32_0 = arith.constant 0 : i32
    %c0_i32_1 = arith.constant 0 : i32
    return %c0_i32, %c0_i32_0 : i32, i32
  }
  func.func @transform_3(%arg0: i32) -> (i32, i32) {
    %c0_i32 = arith.constant 0 : i32
    %c0_i32_0 = arith.constant 0 : i32
    %c0_i32_1 = arith.constant 0 : i32
    return %c0_i32, %c0_i32_0 : i32, i32
  }
  func.func @transform_4(%arg0: i32) -> (i32, i32) {
    %c0_i32 = arith.constant 0 : i32
    %c0_i32_0 = arith.constant 0 : i32
    %c0_i32_1 = arith.constant 0 : i32
    return %c0_i32, %c0_i32_0 : i32, i32
  }
  func.func @transform_5(%arg0: i32) -> (i32, i32) {
    %c0_i32 = arith.constant 0 : i32
    %c0_i32_0 = arith.constant 0 : i32
    %c0_i32_1 = arith.constant 0 : i32
    return %c0_i32, %c0_i32_0 : i32, i32
  }
  func.func @transform_6(%arg0: i32) -> (i32, i32) {
    %c0_i32 = arith.constant 0 : i32
    %c0_i32_0 = arith.constant 0 : i32
    %c0_i32_1 = arith.constant 0 : i32
    return %c0_i32, %c0_i32_0 : i32, i32
  }
  func.func @transform_7(%arg0: i32) -> (i32, i32) {
    %c0_i32 = arith.constant 0 : i32
    %c0_i32_0 = arith.constant 0 : i32
    return %arg0, %c0_i32 : i32, i32
  }
}

</mosaic_0001>

<bundles_post_ra>
// kernel: tpu_custom_call.1
= control target key start
LH: loop header
LB: loop body
LE: loop exit
PB: predicated region body
PF: predicated region fallthrough
CT: control target
= control target key end

     0   :  { %s6955_s0 = inlined_call_operand.vmem [shape: bf16[8,4096], index: 0, kind: input, shape index: {}]   ;;  %s6956_s1 = inlined_call_operand.vmem [shape: bf16[4096,30], index: 1, kind: input, shape index: {}]   ;;  %s6957_s2 = inlined_call_operand.vmem [shape: f32[1,30], index: 2, kind: input, shape index: {}]   ;;  %s6958_s3 = inlined_call_operand.vmem [shape: f32[30,30], index: 3, kind: input, shape index: {}]   ;;  %s6959_s4 = inlined_call_operand.vmem [shape: f32[1,30], index: 4, kind: input, shape index: {}]   ;;  %s6960_s5 = inlined_call_operand.vmem [shape: bf16[30,4096], index: 5, kind: input, shape index: {}]   ;;  %s6961_s6 = inlined_call_operand.vmem [shape: f32[1,4096], index: 6, kind: input, shape index: {}]   ;;  %s6962_s7 = inlined_call_operand.hbm [shape: f32[8,4096], index: 7, kind: output, shape index: {}]  }
   0x1   :  { %v5258_v0 = vld [vmem:[%s6956_s1 + $0x40] sm:$0xff]   ;;  %v5262_v4 = vld [vmem:[%s6956_s1 + $0x48] sm:$0xff]   ;;  %v5266_v8 = vld [vmem:[%s6956_s1 + $0x50] sm:$0xff]  }
   0x2   :  { %v5259_v1 = vld [vmem:[%s6956_s1 + $0xc0] sm:$0xff]   ;;  %4877 = vmatprep.subr.bf16.mxu0 %v5258_v0  ;;  %v5263_v5 = vld [vmem:[%s6956_s1 + $0xc8] sm:$0xff]   ;;  %v5267_v9 = vld [vmem:[%s6956_s1 + $0xd0] sm:$0xff]  }
   0x3   :  { %v5260_v2 = vld [vmem:[%s6956_s1] sm:$0xff]   ;;  %4899 = vmatprep.subr.bf16.mxu1 %v5259_v1  ;;  %v5264_v6 = vld [vmem:[%s6956_s1 + $0x8] sm:$0xff]   ;;  %v5268_v10 = vld [vmem:[%s6956_s1 + $0x10] sm:$0xff]  }
   0x4   :  { %v5261_v3 = vld [vmem:[%s6956_s1 + $0x80] sm:$0xff]   ;;  %4878 = vmatpush3.bf16.msra.mxu0 %v5260_v2  ;;  %v5265_v7 = vld [vmem:[%s6956_s1 + $0x88] sm:$0xff]   ;;  %v5269_v11 = vld [vmem:[%s6956_s1 + $0x90] sm:$0xff]  }
   0x5   :  { %4900 = vmatpush3.bf16.msra.mxu1 %v5261_v3  ;;  %4879 = vmatprep.subr.bf16.mxu0 %v5262_v4  ;;  %v5270_v12 = vld [vmem:[%s6956_s1 + $0x58] sm:$0xff]   ;;  %v5274_v16 = vld [vmem:[%s6956_s1 + $0x60] sm:$0xff]   ;;  %v5278_v20 = vld [vmem:[%s6956_s1 + $0x68] sm:$0xff]  }
   0x6   :  { %4901 = vmatprep.subr.bf16.mxu1 %v5263_v5  ;;  %v5271_v13 = vld [vmem:[%s6956_s1 + $0xd8] sm:$0xff]   ;;  %v5275_v17 = vld [vmem:[%s6956_s1 + $0xe0] sm:$0xff]   ;;  %v5279_v21 = vld [vmem:[%s6956_s1 + $0xe8] sm:$0xff]  }
   0x7   :  { %v5272_v14 = vld [vmem:[%s6956_s1 + $0x18] sm:$0xff]   ;;  %v5276_v18 = vld [vmem:[%s6956_s1 + $0x20] sm:$0xff]   ;;  %v5280_v22 = vld [vmem:[%s6956_s1 + $0x28] sm:$0xff]  }
   0x8   :  { %4880 = vmatpush3.bf16.msra.mxu0 %v5264_v6  ;;  %v5273_v15 = vld [vmem:[%s6956_s1 + $0x98] sm:$0xff]   ;;  %v5277_v19 = vld [vmem:[%s6956_s1 + $0xa0] sm:$0xff]   ;;  %v5281_v23 = vld [vmem:[%s6956_s1 + $0xa8] sm:$0xff]  }
   0x9   :  { %4902 = vmatpush3.bf16.msra.mxu1 %v5265_v7  ;;  %4881 = vmatprep.subr.bf16.mxu0 %v5266_v8  ;;  %v5282_v24 = vld [vmem:[%s6956_s1 + $0x70] sm:$0xff]   ;;  %v5286_v28 = vld [vmem:[%s6956_s1 + $0x78] sm:$0xff]   ;;  %v28_v32 = vld [vmem:[%s6955_s0] sm:$0xff] }
   0xa   :  { %4903 = vmatprep.subr.bf16.mxu1 %v5267_v9  ;;  %v5283_v25 = vld [vmem:[%s6956_s1 + $0xf0] sm:$0xff]   ;;  %v5287_v29 = vld [vmem:[%s6956_s1 + $0xf8] sm:$0xff]   ;;  %v29_v33 = vld [vmem:[%s6955_s0 + $0x8] sm:$0xff]  ;;  %v4458_v34 = vcombine.low %v28_v32, %v28_v32  ;;  %v4459_v35 = vcombine.high %v28_v32, %v28_v32 }
   0xb   :  { %v5284_v26 = vld [vmem:[%s6956_s1 + $0x30] sm:$0xff]   ;;  %v5288_v30 = vld [vmem:[%s6956_s1 + $0x38] sm:$0xff]   ;;  %v4460_v36 = vcombine.low %v29_v33, %v29_v33  ;;  %v4461_v37 = vcombine.high %v29_v33, %v29_v33  ;;  %v5294_v38 = vld [vmem:[%s6956_s1 + $0x140] sm:$0xff]  }
   0xc   :  { %4882 = vmatpush3.bf16.msra.mxu0 %v5268_v10  ;;  %v5285_v27 = vld [vmem:[%s6956_s1 + $0xb0] sm:$0xff]   ;;  %v5289_v31 = vld [vmem:[%s6956_s1 + $0xb8] sm:$0xff]   ;;  %v5295_v39 = vld [vmem:[%s6956_s1 + $0x1c0] sm:$0xff]   ;;  %2243 = vmatprep.mubr.bf16.mxu0 %v4459_v35 }
   0xd   :  { %4904 = vmatpush3.bf16.msra.mxu1 %v5269_v11  ;;  %4883 = vmatprep.subr.bf16.mxu0 %v5270_v12  ;;  %v5296_v40 = vld [vmem:[%s6956_s1 + $0x100] sm:$0xff]   ;;  %v5298_v42 = vld [vmem:[%s6956_s1 + $0x148] sm:$0xff]   ;;  %v5302_v46 = vld [vmem:[%s6956_s1 + $0x150] sm:$0xff]  }
   0xe   :  { %4905 = vmatprep.subr.bf16.mxu1 %v5271_v13  ;;  %2283 = vmatprep.mubr.bf16.mxu1 %v4461_v37  ;;  %v5297_v41 = vld [vmem:[%s6956_s1 + $0x180] sm:$0xff]   ;;  %v5299_v43 = vld [vmem:[%s6956_s1 + $0x1c8] sm:$0xff]   ;;  %v5303_v47 = vld [vmem:[%s6956_s1 + $0x1d0] sm:$0xff]  }
   0xf   :  { %v5300_v44 = vld [vmem:[%s6956_s1 + $0x108] sm:$0xff]   ;;  %v5304_v48 = vld [vmem:[%s6956_s1 + $0x110] sm:$0xff]   ;;  %v5306_v50 = vld [vmem:[%s6956_s1 + $0x158] sm:$0xff]  }
  0x10   :  { %4884 = vmatpush3.bf16.msra.mxu0 %v5272_v14  ;;  %v5301_v45 = vld [vmem:[%s6956_s1 + $0x188] sm:$0xff]   ;;  %v5305_v49 = vld [vmem:[%s6956_s1 + $0x190] sm:$0xff]   ;;  %v5307_v51 = vld [vmem:[%s6956_s1 + $0x1d8] sm:$0xff]  }
  0x11   :  { %4906 = vmatpush3.bf16.msra.mxu1 %v5273_v15  ;;  %4885 = vmatprep.subr.bf16.mxu0 %v5274_v16  ;;  %v5308_v52 = vld [vmem:[%s6956_s1 + $0x118] sm:$0xff]   ;;  %v5310_v54 = vld [vmem:[%s6956_s1 + $0x160] sm:$0xff]   ;;  %v5314_v58 = vld [vmem:[%s6956_s1 + $0x168] sm:$0xff]  }
  0x12   :  { %4907 = vmatprep.subr.bf16.mxu1 %v5275_v17  ;;  %v5309_v53 = vld [vmem:[%s6956_s1 + $0x198] sm:$0xff]   ;;  %v5311_v55 = vld [vmem:[%s6956_s1 + $0x1e0] sm:$0xff]   ;;  %v5315_v59 = vld [vmem:[%s6956_s1 + $0x1e8] sm:$0xff]  }
  0x13   :  { %v5312_v56 = vld [vmem:[%s6956_s1 + $0x120] sm:$0xff]   ;;  %v5316_v60 = vld [vmem:[%s6956_s1 + $0x128] sm:$0xff]   ;;  %v5318_v62 = vld [vmem:[%s6956_s1 + $0x170] sm:$0xff]  }
  0x14   :  { %4886 = vmatpush3.bf16.msra.mxu0 %v5276_v18  ;;  %v5313_v57 = vld [vmem:[%s6956_s1 + $0x1a0] sm:$0xff]   ;;  %v5317_v61 = vld [vmem:[%s6956_s1 + $0x1a8] sm:$0xff]   ;;  %v5319_v63 = vld [vmem:[%s6956_s1 + $0x1f0] sm:$0xff]  }
  0x15   :  { %4908 = vmatpush3.bf16.msra.mxu1 %v5277_v19  ;;  %4887 = vmatprep.subr.bf16.mxu0 %v5278_v20  ;;  %v5320_v0 = vld [vmem:[%s6956_s1 + $0x130] sm:$0xff]   ;;  %v5322_v2 = vld [vmem:[%s6956_s1 + $0x178] sm:$0xff]   ;;  %v5330_v12 = vld [vmem:[%s6956_s1 + $0x240] sm:$0xff]  }
  0x16   :  { %4909 = vmatprep.subr.bf16.mxu1 %v5279_v21  ;;  %v5321_v1 = vld [vmem:[%s6956_s1 + $0x1b0] sm:$0xff]   ;;  %v5323_v3 = vld [vmem:[%s6956_s1 + $0x1f8] sm:$0xff]   ;;  %v5331_v13 = vld [vmem:[%s6956_s1 + $0x2c0] sm:$0xff]  }
  0x17   :  { %v5324_v4 = vld [vmem:[%s6956_s1 + $0x138] sm:$0xff]   ;;  %v30_v6 = vld [vmem:[%s6955_s0 + $0x10] sm:$0xff]  ;;  %v5332_v14 = vld [vmem:[%s6956_s1 + $0x200] sm:$0xff]  }
  0x18   :  { %4888 = vmatpush3.bf16.msra.mxu0 %v5280_v22  ;;  %v5325_v5 = vld [vmem:[%s6956_s1 + $0x1b8] sm:$0xff]   ;;  %v4462_v7 = vcombine.low %v30_v6, %v30_v6  ;;  %v4463_v8 = vcombine.high %v30_v6, %v30_v6  ;;  %v5333_v15 = vld [vmem:[%s6956_s1 + $0x280] sm:$0xff]   ;;  %v5334_v16 = vld [vmem:[%s6956_s1 + $0x248] sm:$0xff]  }
  0x19   :  { %4910 = vmatpush3.bf16.msra.mxu1 %v5281_v23  ;;  %4889 = vmatprep.subr.bf16.mxu0 %v5282_v24  ;;  %v31_v9 = vld [vmem:[%s6955_s0 + $0x18] sm:$0xff]  ;;  %v5335_v17 = vld [vmem:[%s6956_s1 + $0x2c8] sm:$0xff]   ;;  %v5338_v20 = vld [vmem:[%s6956_s1 + $0x250] sm:$0xff]  }
  0x1a   :  { %4911 = vmatprep.subr.bf16.mxu1 %v5283_v25  ;;  %v4464_v10 = vcombine.low %v31_v9, %v31_v9  ;;  %v4465_v11 = vcombine.high %v31_v9, %v31_v9  ;;  %v5336_v18 = vld [vmem:[%s6956_s1 + $0x208] sm:$0xff]   ;;  %v5339_v21 = vld [vmem:[%s6956_s1 + $0x2d0] sm:$0xff]   ;;  %v5342_v24 = vld [vmem:[%s6956_s1 + $0x258] sm:$0xff]  }
  0x1b   :  { %v5337_v19 = vld [vmem:[%s6956_s1 + $0x288] sm:$0xff]   ;;  %v5340_v22 = vld [vmem:[%s6956_s1 + $0x210] sm:$0xff]   ;;  %v5343_v25 = vld [vmem:[%s6956_s1 + $0x2d8] sm:$0xff]  }
  0x1c   :  { %4890 = vmatpush3.bf16.msra.mxu0 %v5284_v26  ;;  %v5341_v23 = vld [vmem:[%s6956_s1 + $0x290] sm:$0xff]   ;;  %v5344_v26 = vld [vmem:[%s6956_s1 + $0x218] sm:$0xff]   ;;  %v5350_v32 = vld [vmem:[%s6956_s1 + $0x268] sm:$0xff]  }
  0x1d   :  { %4912 = vmatpush3.bf16.msra.mxu1 %v5285_v27  ;;  %4891 = vmatprep.subr.bf16.mxu0 %v5286_v28  ;;  %v5345_v27 = vld [vmem:[%s6956_s1 + $0x298] sm:$0xff]   ;;  %v5346_v28 = vld [vmem:[%s6956_s1 + $0x260] sm:$0xff]   ;;  %v5351_v33 = vld [vmem:[%s6956_s1 + $0x2e8] sm:$0xff]  }
  0x1e   :  { %4913 = vmatprep.subr.bf16.mxu1 %v5287_v29  ;;  %v5347_v29 = vld [vmem:[%s6956_s1 + $0x2e0] sm:$0xff]   ;;  %v5353_v35 = vld [vmem:[%s6956_s1 + $0x2a8] sm:$0xff]   ;;  %v5355_v37 = vld [vmem:[%s6956_s1 + $0x2f0] sm:$0xff]  }
  0x1f   :  { %v5386_v6 = vld [vmem:[%s6956_s1 + $0x368] sm:$0xff]  }
  0x20   :  { %4892 = vmatpush3.bf16.msra.mxu0 %v5288_v30  ;;  %v5348_v30 = vld [vmem:[%s6956_s1 + $0x220] sm:$0xff]   ;;  %v5389_v9 = vld [vmem:[%s6956_s1 + $0x3a8] sm:$0xff]  }
  0x21   :  { %4914 = vmatpush3.bf16.msra.mxu1 %v5289_v31  ;;  %4921 = vmatprep.subr.bf16.mxu0 %v5294_v38  ;;  %v5349_v31 = vld [vmem:[%s6956_s1 + $0x2a0] sm:$0xff]   ;;  %v5356_v38 = vld [vmem:[%s6956_s1 + $0x230] sm:$0xff]  }
  0x22   :  { %4943 = vmatprep.subr.bf16.mxu1 %v5295_v39  ;;  %v5357_v39 = vld [vmem:[%s6956_s1 + $0x2b0] sm:$0xff]  }
  0x23   :  { %2244 = vmatmul.mubr.bf16.vlgmr.msra.gmra.mrb[0].mxu0 %v4458_v34  ;;  %v5352_v34 = vld [vmem:[%s6956_s1 + $0x228] sm:$0xff]  }
  0x24   :  { %2284 = vmatmul.mubr.bf16.vlgmr.msra.gmra.mrb[0].mxu1 %v4460_v36  ;;  %4922 = vmatpush3.bf16.msra.mxu0 %v5296_v40  ;;  %v5354_v36 = vld [vmem:[%s6956_s1 + $0x270] sm:$0xff]   ;;  %v5358_v40 = vld [vmem:[%s6956_s1 + $0x278] sm:$0xff]  }
  0x25   :  { %4944 = vmatpush3.bf16.msra.mxu1 %v5297_v41  ;;  %4923 = vmatprep.subr.bf16.mxu0 %v5298_v42  ;;  %v5359_v41 = vld [vmem:[%s6956_s1 + $0x2f8] sm:$0xff]  }
  0x26   :  { %4945 = vmatprep.subr.bf16.mxu1 %v5299_v43  ;;  %2323 = vmatprep.mubr.bf16.mxu0 %v4463_v8  ;;  %v5360_v42 = vld [vmem:[%s6956_s1 + $0x238] sm:$0xff]   ;;  %v5388_v8 = vld [vmem:[%s6956_s1 + $0x328] sm:$0xff]  }
  0x27   :  { %2363 = vmatprep.mubr.bf16.mxu1 %v4465_v11  ;;  %v5361_v43 = vld [vmem:[%s6956_s1 + $0x2b8] sm:$0xff]   ;;  %v5391_v11 = vld [vmem:[%s6956_s1 + $0x3f0] sm:$0xff]  }
  0x28   :  { %4924 = vmatpush3.bf16.msra.mxu0 %v5300_v44  ;;  %v32_v44 = vld [vmem:[%s6955_s0 + $0x20] sm:$0xff] }
  0x29   :  { %4946 = vmatpush3.bf16.msra.mxu1 %v5301_v45  ;;  %4925 = vmatprep.subr.bf16.mxu0 %v5302_v46  ;;  %v33_v45 = vld [vmem:[%s6955_s0 + $0x28] sm:$0xff]  ;;  %v4466_v46 = vcombine.low %v32_v44, %v32_v44 }
  0x2a   :  { %4947 = vmatprep.subr.bf16.mxu1 %v5303_v47  ;;  %v4467_v47 = vcombine.high %v32_v44, %v32_v44  ;;  %v5422_v44 = vld [vmem:[%s6956_s1 + $0x468] sm:$0xff]  }
  0x2c   :  { %4926 = vmatpush3.bf16.msra.mxu0 %v5304_v48  ;;  %v4468_v48 = vcombine.low %v33_v45, %v33_v45 }
  0x2d   :  { %4948 = vmatpush3.bf16.msra.mxu1 %v5305_v49  ;;  %4927 = vmatprep.subr.bf16.mxu0 %v5306_v50  ;;  %v4469_v49 = vcombine.high %v33_v45, %v33_v45  ;;  %v5366_v50 = vld [vmem:[%s6956_s1 + $0x340] sm:$0xff]   ;;  %v5423_v45 = vld [vmem:[%s6956_s1 + $0x4e8] sm:$0xff]  }
  0x2e   :  { %4949 = vmatprep.subr.bf16.mxu1 %v5307_v51  ;;  %v5367_v51 = vld [vmem:[%s6956_s1 + $0x3c0] sm:$0xff]  }
  0x30   :  { %4928 = vmatpush3.bf16.msra.mxu0 %v5308_v52  ;;  %v5368_v52 = vld [vmem:[%s6956_s1 + $0x300] sm:$0xff]  }
  0x31   :  { %4950 = vmatpush3.bf16.msra.mxu1 %v5309_v53  ;;  %4929 = vmatprep.subr.bf16.mxu0 %v5310_v54  ;;  %v5369_v53 = vld [vmem:[%s6956_s1 + $0x380] sm:$0xff]   ;;  %v5370_v54 = vld [vmem:[%s6956_s1 + $0x348] sm:$0xff]  }
  0x32   :  { %4951 = vmatprep.subr.bf16.mxu1 %v5311_v55  ;;  %v5371_v55 = vld [vmem:[%s6956_s1 + $0x3c8] sm:$0xff]  }
  0x34   :  { %4930 = vmatpush3.bf16.msra.mxu0 %v5312_v56  ;;  %v5372_v56 = vld [vmem:[%s6956_s1 + $0x308] sm:$0xff]  }
  0x35   :  { %4952 = vmatpush3.bf16.msra.mxu1 %v5313_v57  ;;  %4931 = vmatprep.subr.bf16.mxu0 %v5314_v58  ;;  %v5373_v57 = vld [vmem:[%s6956_s1 + $0x388] sm:$0xff]   ;;  %v5374_v58 = vld [vmem:[%s6956_s1 + $0x350] sm:$0xff]  }
  0x36   :  { %4953 = vmatprep.subr.bf16.mxu1 %v5315_v59  ;;  %v5375_v59 = vld [vmem:[%s6956_s1 + $0x3d0] sm:$0xff]  }
  0x38   :  { %4932 = vmatpush3.bf16.msra.mxu0 %v5316_v60  ;;  %v5376_v60 = vld [vmem:[%s6956_s1 + $0x310] sm:$0xff]  }
  0x39   :  { %4954 = vmatpush3.bf16.msra.mxu1 %v5317_v61  ;;  %4933 = vmatprep.subr.bf16.mxu0 %v5318_v62  ;;  %v5377_v61 = vld [vmem:[%s6956_s1 + $0x390] sm:$0xff]   ;;  %v5378_v62 = vld [vmem:[%s6956_s1 + $0x358] sm:$0xff]  }
  0x3a   :  { %4955 = vmatprep.subr.bf16.mxu1 %v5319_v63  ;;  %v5379_v63 = vld [vmem:[%s6956_s1 + $0x3d8] sm:$0xff]  }
  0x3c   :  { %4934 = vmatpush3.bf16.msra.mxu0 %v5320_v0  ;;  %v5380_v0 = vld [vmem:[%s6956_s1 + $0x318] sm:$0xff]  }
  0x3d   :  { %4956 = vmatpush3.bf16.msra.mxu1 %v5321_v1  ;;  %4935 = vmatprep.subr.bf16.mxu0 %v5322_v2  ;;  %v5381_v1 = vld [vmem:[%s6956_s1 + $0x398] sm:$0xff]   ;;  %v5382_v2 = vld [vmem:[%s6956_s1 + $0x360] sm:$0xff]  }
  0x3e   :  { %4957 = vmatprep.subr.bf16.mxu1 %v5323_v3  ;;  %v5383_v3 = vld [vmem:[%s6956_s1 + $0x3e0] sm:$0xff]  }
  0x40   :  { %4936 = vmatpush3.bf16.msra.mxu0 %v5324_v4  ;;  %v5384_v4 = vld [vmem:[%s6956_s1 + $0x320] sm:$0xff]  }
  0x41   :  { %4958 = vmatpush3.bf16.msra.mxu1 %v5325_v5  ;;  %4965 = vmatprep.subr.bf16.mxu0 %v5330_v12  ;;  %v5385_v5 = vld [vmem:[%s6956_s1 + $0x3a0] sm:$0xff]   ;;  %v5392_v12 = vld [vmem:[%s6956_s1 + $0x330] sm:$0xff]  }
  0x42   :  { %4987 = vmatprep.subr.bf16.mxu1 %v5331_v13  ;;  %v5393_v13 = vld [vmem:[%s6956_s1 + $0x3b0] sm:$0xff]  }
  0x43   :  { %2324 = vmatmul.mubr.bf16.vlgmr.msra.gmra.mrb[4].mxu0 %v4462_v7  ;;  %v5387_v7 = vld [vmem:[%s6956_s1 + $0x3e8] sm:$0xff]  }
  0x44   :  { %2364 = vmatmul.mubr.bf16.vlgmr.msra.gmra.mrb[4].mxu1 %v4464_v10  ;;  %4966 = vmatpush3.bf16.msra.mxu0 %v5332_v14  ;;  %v5390_v10 = vld [vmem:[%s6956_s1 + $0x370] sm:$0xff]   ;;  %v5394_v14 = vld [vmem:[%s6956_s1 + $0x378] sm:$0xff]  }
  0x45   :  { %4988 = vmatpush3.bf16.msra.mxu1 %v5333_v15  ;;  %4967 = vmatprep.subr.bf16.mxu0 %v5334_v16  ;;  %v5395_v15 = vld [vmem:[%s6956_s1 + $0x3f8] sm:$0xff]  }
  0x46   :  { %4989 = vmatprep.subr.bf16.mxu1 %v5335_v17  ;;  %2403 = vmatprep.mubr.bf16.mxu0 %v4467_v47  ;;  %v5396_v16 = vld [vmem:[%s6956_s1 + $0x338] sm:$0xff]   ;;  %v5425_v47 = vld [vmem:[%s6956_s1 + $0x4a8] sm:$0xff]  }
  0x47   :  { %2443 = vmatprep.mubr.bf16.mxu1 %v4469_v49  ;;  %v5397_v17 = vld [vmem:[%s6956_s1 + $0x3b8] sm:$0xff]   ;;  %v5427_v49 = vld [vmem:[%s6956_s1 + $0x4f0] sm:$0xff]  }
  0x48   :  { %4968 = vmatpush3.bf16.msra.mxu0 %v5336_v18  ;;  %v34_v18 = vld [vmem:[%s6955_s0 + $0x30] sm:$0xff] }
  0x49   :  { %4990 = vmatpush3.bf16.msra.mxu1 %v5337_v19  ;;  %4969 = vmatprep.subr.bf16.mxu0 %v5338_v20  ;;  %v35_v19 = vld [vmem:[%s6955_s0 + $0x38] sm:$0xff]  ;;  %v4470_v20 = vcombine.low %v34_v18, %v34_v18 }
  0x4a   :  { %4991 = vmatprep.subr.bf16.mxu1 %v5339_v21  ;;  %v4471_v21 = vcombine.high %v34_v18, %v34_v18  ;;  %v5458_v18 = vld [vmem:[%s6956_s1 + $0x568] sm:$0xff]  }
  0x4c   :  { %4970 = vmatpush3.bf16.msra.mxu0 %v5340_v22  ;;  %v4472_v22 = vcombine.low %v35_v19, %v35_v19 }
  0x4d   :  { %4992 = vmatpush3.bf16.msra.mxu1 %v5341_v23  ;;  %4971 = vmatprep.subr.bf16.mxu0 %v5342_v24  ;;  %v5402_v23 = vld [vmem:[%s6956_s1 + $0x440] sm:$0xff]   ;;  %v4473_v24 = vcombine.high %v35_v19, %v35_v19  ;;  %v5459_v19 = vld [vmem:[%s6956_s1 + $0x5e8] sm:$0xff]  }
  0x4e   :  { %4993 = vmatprep.subr.bf16.mxu1 %v5343_v25  ;;  %v5403_v25 = vld [vmem:[%s6956_s1 + $0x4c0] sm:$0xff]  }
  0x50   :  { %4972 = vmatpush3.bf16.msra.mxu0 %v5344_v26  ;;  %v5404_v26 = vld [vmem:[%s6956_s1 + $0x400] sm:$0xff]  }
  0x51   :  { %4994 = vmatpush3.bf16.msra.mxu1 %v5345_v27  ;;  %4973 = vmatprep.subr.bf16.mxu0 %v5346_v28  ;;  %v5405_v27 = vld [vmem:[%s6956_s1 + $0x480] sm:$0xff]   ;;  %v5406_v28 = vld [vmem:[%s6956_s1 + $0x448] sm:$0xff]  }
  0x52   :  { %4995 = vmatprep.subr.bf16.mxu1 %v5347_v29  ;;  %v5407_v29 = vld [vmem:[%s6956_s1 + $0x4c8] sm:$0xff]  }
  0x54   :  { %4974 = vmatpush3.bf16.msra.mxu0 %v5348_v30  ;;  %v5408_v30 = vld [vmem:[%s6956_s1 + $0x408] sm:$0xff]  }
  0x55   :  { %4996 = vmatpush3.bf16.msra.mxu1 %v5349_v31  ;;  %4975 = vmatprep.subr.bf16.mxu0 %v5350_v32  ;;  %v5409_v31 = vld [vmem:[%s6956_s1 + $0x488] sm:$0xff]   ;;  %v5410_v32 = vld [vmem:[%s6956_s1 + $0x450] sm:$0xff]  }
  0x56   :  { %4997 = vmatprep.subr.bf16.mxu1 %v5351_v33  ;;  %v5411_v33 = vld [vmem:[%s6956_s1 + $0x4d0] sm:$0xff]  }
  0x58   :  { %4976 = vmatpush3.bf16.msra.mxu0 %v5352_v34  ;;  %v5412_v34 = vld [vmem:[%s6956_s1 + $0x410] sm:$0xff]  }
  0x59   :  { %4998 = vmatpush3.bf16.msra.mxu1 %v5353_v35  ;;  %4977 = vmatprep.subr.bf16.mxu0 %v5354_v36  ;;  %v5413_v35 = vld [vmem:[%s6956_s1 + $0x490] sm:$0xff]   ;;  %v5414_v36 = vld [vmem:[%s6956_s1 + $0x458] sm:$0xff]  }
  0x5a   :  { %4999 = vmatprep.subr.bf16.mxu1 %v5355_v37  ;;  %v5415_v37 = vld [vmem:[%s6956_s1 + $0x4d8] sm:$0xff]  }
  0x5c   :  { %4978 = vmatpush3.bf16.msra.mxu0 %v5356_v38  ;;  %v5416_v38 = vld [vmem:[%s6956_s1 + $0x418] sm:$0xff]  }
  0x5d   :  { %5000 = vmatpush3.bf16.msra.mxu1 %v5357_v39  ;;  %4979 = vmatprep.subr.bf16.mxu0 %v5358_v40  ;;  %v5417_v39 = vld [vmem:[%s6956_s1 + $0x498] sm:$0xff]   ;;  %v5418_v40 = vld [vmem:[%s6956_s1 + $0x460] sm:$0xff]  }
  0x5e   :  { %5001 = vmatprep.subr.bf16.mxu1 %v5359_v41  ;;  %v5419_v41 = vld [vmem:[%s6956_s1 + $0x4e0] sm:$0xff]  }
  0x60   :  { %4980 = vmatpush3.bf16.msra.mxu0 %v5360_v42  ;;  %v5420_v42 = vld [vmem:[%s6956_s1 + $0x420] sm:$0xff]  }
  0x61   :  { %5002 = vmatpush3.bf16.msra.mxu1 %v5361_v43  ;;  %5009 = vmatprep.subr.bf16.mxu0 %v5366_v50  ;;  %v5421_v43 = vld [vmem:[%s6956_s1 + $0x4a0] sm:$0xff]   ;;  %v5428_v50 = vld [vmem:[%s6956_s1 + $0x430] sm:$0xff]  }
  0x62   :  { %5031 = vmatprep.subr.bf16.mxu1 %v5367_v51  ;;  %v5429_v51 = vld [vmem:[%s6956_s1 + $0x4b0] sm:$0xff]  }
  0x63   :  { %2404 = vmatmul.mubr.bf16.vlgmr.msra.gmra.mrb[8].mxu0 %v4466_v46  ;;  %v5424_v46 = vld [vmem:[%s6956_s1 + $0x428] sm:$0xff]  }
  0x64   :  { %2444 = vmatmul.mubr.bf16.vlgmr.msra.gmra.mrb[8].mxu1 %v4468_v48  ;;  %5010 = vmatpush3.bf16.msra.mxu0 %v5368_v52  ;;  %v5426_v48 = vld [vmem:[%s6956_s1 + $0x470] sm:$0xff]   ;;  %v5430_v52 = vld [vmem:[%s6956_s1 + $0x478] sm:$0xff]  }
  0x65   :  { %5032 = vmatpush3.bf16.msra.mxu1 %v5369_v53  ;;  %5011 = vmatprep.subr.bf16.mxu0 %v5370_v54  ;;  %v5431_v53 = vld [vmem:[%s6956_s1 + $0x4f8] sm:$0xff]  }
  0x66   :  { %5033 = vmatprep.subr.bf16.mxu1 %v5371_v55  ;;  %2483 = vmatprep.mubr.bf16.mxu0 %v4471_v21  ;;  %v5432_v54 = vld [vmem:[%s6956_s1 + $0x438] sm:$0xff]   ;;  %v5461_v21 = vld [vmem:[%s6956_s1 + $0x5a8] sm:$0xff]  }
  0x67   :  { %2523 = vmatprep.mubr.bf16.mxu1 %v4473_v24  ;;  %v5433_v55 = vld [vmem:[%s6956_s1 + $0x4b8] sm:$0xff]   ;;  %v5464_v24 = vld [vmem:[%s6956_s1 + $0x530] sm:$0xff]  }
  0x68   :  { %5012 = vmatpush3.bf16.msra.mxu0 %v5372_v56  ;;  %v36_v56 = vld [vmem:[%s6955_s0 + $0x40] sm:$0xff] }
  0x69   :  { %5034 = vmatpush3.bf16.msra.mxu1 %v5373_v57  ;;  %5013 = vmatprep.subr.bf16.mxu0 %v5374_v58  ;;  %v4474_v57 = vcombine.low %v36_v56, %v36_v56  ;;  %v4475_v58 = vcombine.high %v36_v56, %v36_v56  ;;  %v5494_v56 = vld [vmem:[%s6956_s1 + $0x668] sm:$0xff]  }
  0x6a   :  { %5035 = vmatprep.subr.bf16.mxu1 %v5375_v59  ;;  %v37_v59 = vld [vmem:[%s6955_s0 + $0x48] sm:$0xff] }
  0x6c   :  { %5014 = vmatpush3.bf16.msra.mxu0 %v5376_v60  ;;  %v4476_v60 = vcombine.low %v37_v59, %v37_v59 }
  0x6d   :  { %5036 = vmatpush3.bf16.msra.mxu1 %v5377_v61  ;;  %5015 = vmatprep.subr.bf16.mxu0 %v5378_v62  ;;  %v4477_v61 = vcombine.high %v37_v59, %v37_v59  ;;  %v5438_v62 = vld [vmem:[%s6956_s1 + $0x540] sm:$0xff]   ;;  %v5497_v59 = vld [vmem:[%s6956_s1 + $0x6a8] sm:$0xff]  }
  0x6e   :  { %5037 = vmatprep.subr.bf16.mxu1 %v5379_v63  ;;  %v5439_v63 = vld [vmem:[%s6956_s1 + $0x5c0] sm:$0xff]  }
  0x70   :  { %5016 = vmatpush3.bf16.msra.mxu0 %v5380_v0  ;;  %v5440_v0 = vld [vmem:[%s6956_s1 + $0x500] sm:$0xff]  }
  0x71   :  { %5038 = vmatpush3.bf16.msra.mxu1 %v5381_v1  ;;  %5017 = vmatprep.subr.bf16.mxu0 %v5382_v2  ;;  %v5441_v1 = vld [vmem:[%s6956_s1 + $0x580] sm:$0xff]   ;;  %v5442_v2 = vld [vmem:[%s6956_s1 + $0x548] sm:$0xff]  }
  0x72   :  { %5039 = vmatprep.subr.bf16.mxu1 %v5383_v3  ;;  %v5443_v3 = vld [vmem:[%s6956_s1 + $0x5c8] sm:$0xff]  }
  0x74   :  { %5018 = vmatpush3.bf16.msra.mxu0 %v5384_v4  ;;  %v5444_v4 = vld [vmem:[%s6956_s1 + $0x508] sm:$0xff]  }
  0x75   :  { %5040 = vmatpush3.bf16.msra.mxu1 %v5385_v5  ;;  %5019 = vmatprep.subr.bf16.mxu0 %v5386_v6  ;;  %v5445_v5 = vld [vmem:[%s6956_s1 + $0x588] sm:$0xff]   ;;  %v5446_v6 = vld [vmem:[%s6956_s1 + $0x550] sm:$0xff]  }
  0x76   :  { %5041 = vmatprep.subr.bf16.mxu1 %v5387_v7  ;;  %v5447_v7 = vld [vmem:[%s6956_s1 + $0x5d0] sm:$0xff]  }
  0x78   :  { %5020 = vmatpush3.bf16.msra.mxu0 %v5388_v8  ;;  %v5448_v8 = vld [vmem:[%s6956_s1 + $0x510] sm:$0xff]  }
  0x79   :  { %5042 = vmatpush3.bf16.msra.mxu1 %v5389_v9  ;;  %5021 = vmatprep.subr.bf16.mxu0 %v5390_v10  ;;  %v5449_v9 = vld [vmem:[%s6956_s1 + $0x590] sm:$0xff]   ;;  %v5450_v10 = vld [vmem:[%s6956_s1 + $0x558] sm:$0xff]  }
  0x7a   :  { %5043 = vmatprep.subr.bf16.mxu1 %v5391_v11  ;;  %v5451_v11 = vld [vmem:[%s6956_s1 + $0x5d8] sm:$0xff]  }
  0x7c   :  { %5022 = vmatpush3.bf16.msra.mxu0 %v5392_v12  ;;  %v5452_v12 = vld [vmem:[%s6956_s1 + $0x518] sm:$0xff]  }
  0x7d   :  { %5044 = vmatpush3.bf16.msra.mxu1 %v5393_v13  ;;  %5023 = vmatprep.subr.bf16.mxu0 %v5394_v14  ;;  %v5453_v13 = vld [vmem:[%s6956_s1 + $0x598] sm:$0xff]   ;;  %v5454_v14 = vld [vmem:[%s6956_s1 + $0x560] sm:$0xff]  }
  0x7e   :  { %5045 = vmatprep.subr.bf16.mxu1 %v5395_v15  ;;  %v5455_v15 = vld [vmem:[%s6956_s1 + $0x5e0] sm:$0xff]  }
  0x80   :  { %5024 = vmatpush3.bf16.msra.mxu0 %v5396_v16  ;;  %v5456_v16 = vld [vmem:[%s6956_s1 + $0x520] sm:$0xff]  }
  0x81   :  { %5046 = vmatpush3.bf16.msra.mxu1 %v5397_v17  ;;  %5053 = vmatprep.subr.bf16.mxu0 %v5402_v23  ;;  %v5457_v17 = vld [vmem:[%s6956_s1 + $0x5a0] sm:$0xff]   ;;  %v5463_v23 = vld [vmem:[%s6956_s1 + $0x5f0] sm:$0xff]  }
  0x82   :  { %5075 = vmatprep.subr.bf16.mxu1 %v5403_v25  ;;  %v5465_v25 = vld [vmem:[%s6956_s1 + $0x5b0] sm:$0xff]  }
  0x83   :  { %2484 = vmatmul.mubr.bf16.vlgmr.msra.gmra.mrb[12].mxu0 %v4470_v20  ;;  %v5460_v20 = vld [vmem:[%s6956_s1 + $0x528] sm:$0xff]  }
  0x84   :  { %2524 = vmatmul.mubr.bf16.vlgmr.msra.gmra.mrb[12].mxu1 %v4472_v22  ;;  %5054 = vmatpush3.bf16.msra.mxu0 %v5404_v26  ;;  %v5462_v22 = vld [vmem:[%s6956_s1 + $0x570] sm:$0xff]   ;;  %v5466_v26 = vld [vmem:[%s6956_s1 + $0x578] sm:$0xff]  }
  0x85   :  { %5076 = vmatpush3.bf16.msra.mxu1 %v5405_v27  ;;  %5055 = vmatprep.subr.bf16.mxu0 %v5406_v28  ;;  %v5467_v27 = vld [vmem:[%s6956_s1 + $0x5f8] sm:$0xff]  }
  0x86   :  { %5077 = vmatprep.subr.bf16.mxu1 %v5407_v29  ;;  %2563 = vmatprep.mubr.bf16.mxu0 %v4475_v58  ;;  %v5468_v28 = vld [vmem:[%s6956_s1 + $0x538] sm:$0xff]   ;;  %v5496_v58 = vld [vmem:[%s6956_s1 + $0x628] sm:$0xff]  }
  0x87   :  { %2603 = vmatprep.mubr.bf16.mxu1 %v4477_v61  ;;  %v5469_v29 = vld [vmem:[%s6956_s1 + $0x5b8] sm:$0xff]   ;;  %v5499_v61 = vld [vmem:[%s6956_s1 + $0x6f0] sm:$0xff]  }
  0x88   :  { %5056 = vmatpush3.bf16.msra.mxu0 %v5408_v30  ;;  %v38_v30 = vld [vmem:[%s6955_s0 + $0x50] sm:$0xff] }
  0x89   :  { %5078 = vmatpush3.bf16.msra.mxu1 %v5409_v31  ;;  %5057 = vmatprep.subr.bf16.mxu0 %v5410_v32  ;;  %v39_v31 = vld [vmem:[%s6955_s0 + $0x58] sm:$0xff]  ;;  %v4478_v32 = vcombine.low %v38_v30, %v38_v30 }
  0x8a   :  { %5079 = vmatprep.subr.bf16.mxu1 %v5411_v33  ;;  %v4479_v33 = vcombine.high %v38_v30, %v38_v30  ;;  %v5529_v30 = vld [vmem:[%s6956_s1 + $0x7a0] sm:$0xff]  }
  0x8c   :  { %5058 = vmatpush3.bf16.msra.mxu0 %v5412_v34  ;;  %v4480_v34 = vcombine.low %v39_v31, %v39_v31 }
  0x8d   :  { %5080 = vmatpush3.bf16.msra.mxu1 %v5413_v35  ;;  %5059 = vmatprep.subr.bf16.mxu0 %v5414_v36  ;;  %v4481_v35 = vcombine.high %v39_v31, %v39_v31  ;;  %v5474_v36 = vld [vmem:[%s6956_s1 + $0x640] sm:$0xff]  }
  0x8e   :  { %5081 = vmatprep.subr.bf16.mxu1 %v5415_v37  ;;  %v5475_v37 = vld [vmem:[%s6956_s1 + $0x6c0] sm:$0xff]  }
  0x90   :  { %5060 = vmatpush3.bf16.msra.mxu0 %v5416_v38  ;;  %v5476_v38 = vld [vmem:[%s6956_s1 + $0x600] sm:$0xff]  }
  0x91   :  { %5082 = vmatpush3.bf16.msra.mxu1 %v5417_v39  ;;  %5061 = vmatprep.subr.bf16.mxu0 %v5418_v40  ;;  %v5477_v39 = vld [vmem:[%s6956_s1 + $0x680] sm:$0xff]   ;;  %v5478_v40 = vld [vmem:[%s6956_s1 + $0x648] sm:$0xff]  }
  0x92   :  { %5083 = vmatprep.subr.bf16.mxu1 %v5419_v41  ;;  %v5479_v41 = vld [vmem:[%s6956_s1 + $0x6c8] sm:$0xff]  }
  0x94   :  { %5062 = vmatpush3.bf16.msra.mxu0 %v5420_v42  ;;  %v5480_v42 = vld [vmem:[%s6956_s1 + $0x608] sm:$0xff]  }
  0x95   :  { %5084 = vmatpush3.bf16.msra.mxu1 %v5421_v43  ;;  %5063 = vmatprep.subr.bf16.mxu0 %v5422_v44  ;;  %v5481_v43 = vld [vmem:[%s6956_s1 + $0x688] sm:$0xff]   ;;  %v5482_v44 = vld [vmem:[%s6956_s1 + $0x650] sm:$0xff]  }
  0x96   :  { %5085 = vmatprep.subr.bf16.mxu1 %v5423_v45  ;;  %v5483_v45 = vld [vmem:[%s6956_s1 + $0x6d0] sm:$0xff]  }
  0x98   :  { %5064 = vmatpush3.bf16.msra.mxu0 %v5424_v46  ;;  %v5484_v46 = vld [vmem:[%s6956_s1 + $0x610] sm:$0xff]  }
  0x99   :  { %5086 = vmatpush3.bf16.msra.mxu1 %v5425_v47  ;;  %5065 = vmatprep.subr.bf16.mxu0 %v5426_v48  ;;  %v5485_v47 = vld [vmem:[%s6956_s1 + $0x690] sm:$0xff]   ;;  %v5486_v48 = vld [vmem:[%s6956_s1 + $0x658] sm:$0xff]  }
  0x9a   :  { %5087 = vmatprep.subr.bf16.mxu1 %v5427_v49  ;;  %v5487_v49 = vld [vmem:[%s6956_s1 + $0x6d8] sm:$0xff]  }
  0x9c   :  { %5066 = vmatpush3.bf16.msra.mxu0 %v5428_v50  ;;  %v5488_v50 = vld [vmem:[%s6956_s1 + $0x618] sm:$0xff]  }
  0x9d   :  { %5088 = vmatpush3.bf16.msra.mxu1 %v5429_v51  ;;  %5067 = vmatprep.subr.bf16.mxu0 %v5430_v52  ;;  %v5489_v51 = vld [vmem:[%s6956_s1 + $0x698] sm:$0xff]   ;;  %v5490_v52 = vld [vmem:[%s6956_s1 + $0x660] sm:$0xff]  }
  0x9e   :  { %5089 = vmatprep.subr.bf16.mxu1 %v5431_v53  ;;  %v5491_v53 = vld [vmem:[%s6956_s1 + $0x6e0] sm:$0xff]  }
  0xa0   :  { %5068 = vmatpush3.bf16.msra.mxu0 %v5432_v54  ;;  %v5492_v54 = vld [vmem:[%s6956_s1 + $0x620] sm:$0xff]  }
  0xa1   :  { %5090 = vmatpush3.bf16.msra.mxu1 %v5433_v55  ;;  %5097 = vmatprep.subr.bf16.mxu0 %v5438_v62  ;;  %v5493_v55 = vld [vmem:[%s6956_s1 + $0x6a0] sm:$0xff]   ;;  %v5500_v62 = vld [vmem:[%s6956_s1 + $0x630] sm:$0xff]  }
  0xa2   :  { %5119 = vmatprep.subr.bf16.mxu1 %v5439_v63  ;;  %v5501_v63 = vld [vmem:[%s6956_s1 + $0x6b0] sm:$0xff]  }
  0xa3   :  { %2564 = vmatmul.mubr.bf16.vlgmr.msra.gmra.mrb[16].mxu0 %v4474_v57  ;;  %v5495_v57 = vld [vmem:[%s6956_s1 + $0x6e8] sm:$0xff]  }
  0xa4   :  { %2604 = vmatmul.mubr.bf16.vlgmr.msra.gmra.mrb[16].mxu1 %v4476_v60  ;;  %5098 = vmatpush3.bf16.msra.mxu0 %v5440_v0  ;;  %v5498_v60 = vld [vmem:[%s6956_s1 + $0x670] sm:$0xff]   ;;  %v5502_v0 = vld [vmem:[%s6956_s1 + $0x678] sm:$0xff]  }
  0xa5   :  { %5120 = vmatpush3.bf16.msra.mxu1 %v5441_v1  ;;  %5099 = vmatprep.subr.bf16.mxu0 %v5442_v2  ;;  %v5503_v1 = vld [vmem:[%s6956_s1 + $0x6f8] sm:$0xff]  }
  0xa6   :  { %5121 = vmatprep.subr.bf16.mxu1 %v5443_v3  ;;  %2643 = vmatprep.mubr.bf16.mxu0 %v4479_v33  ;;  %v5504_v2 = vld [vmem:[%s6956_s1 + $0x638] sm:$0xff]  }
  0xa7   :  { %2683 = vmatprep.mubr.bf16.mxu1 %v4481_v35  ;;  %v5505_v3 = vld [vmem:[%s6956_s1 + $0x6b8] sm:$0xff]  }
  0xa8   :  { %5100 = vmatpush3.bf16.msra.mxu0 %v5444_v4  ;;  %v40_v4 = vld [vmem:[%s6955_s0 + $0x60] sm:$0xff] }
  0xa9   :  { %5122 = vmatpush3.bf16.msra.mxu1 %v5445_v5  ;;  %5101 = vmatprep.subr.bf16.mxu0 %v5446_v6  ;;  %v41_v5 = vld [vmem:[%s6955_s0 + $0x68] sm:$0xff]  ;;  %v4482_v6 = vcombine.low %v40_v4, %v40_v4 }
  0xaa   :  { %5123 = vmatprep.subr.bf16.mxu1 %v5447_v7  ;;  %v4483_v7 = vcombine.high %v40_v4, %v40_v4 }
  0xac   :  { %5102 = vmatpush3.bf16.msra.mxu0 %v5448_v8  ;;  %v4484_v8 = vcombine.low %v41_v5, %v41_v5 }
  0xad   :  { %5124 = vmatpush3.bf16.msra.mxu1 %v5449_v9  ;;  %5103 = vmatprep.subr.bf16.mxu0 %v5450_v10  ;;  %v5510_v9 = vld [vmem:[%s6956_s1 + $0x740] sm:$0xff]   ;;  %v4485_v10 = vcombine.high %v41_v5, %v41_v5 }
  0xae   :  { %5125 = vmatprep.subr.bf16.mxu1 %v5451_v11  ;;  %v5511_v11 = vld [vmem:[%s6956_s1 + $0x7c0] sm:$0xff]  }
  0xb0   :  { %5104 = vmatpush3.bf16.msra.mxu0 %v5452_v12  ;;  %v5512_v12 = vld [vmem:[%s6956_s1 + $0x700] sm:$0xff]  }
  0xb1   :  { %5126 = vmatpush3.bf16.msra.mxu1 %v5453_v13  ;;  %5105 = vmatprep.subr.bf16.mxu0 %v5454_v14  ;;  %v5513_v13 = vld [vmem:[%s6956_s1 + $0x780] sm:$0xff]   ;;  %v5514_v14 = vld [vmem:[%s6956_s1 + $0x748] sm:$0xff]  }
  0xb2   :  { %5127 = vmatprep.subr.bf16.mxu1 %v5455_v15  ;;  %v5515_v15 = vld [vmem:[%s6956_s1 + $0x7c8] sm:$0xff]  }
  0xb4   :  { %5106 = vmatpush3.bf16.msra.mxu0 %v5456_v16  ;;  %v5516_v16 = vld [vmem:[%s6956_s1 + $0x708] sm:$0xff]  }
  0xb5   :  { %5128 = vmatpush3.bf16.msra.mxu1 %v5457_v17  ;;  %5107 = vmatprep.subr.bf16.mxu0 %v5458_v18  ;;  %v5517_v17 = vld [vmem:[%s6956_s1 + $0x788] sm:$0xff]   ;;  %v5518_v18 = vld [vmem:[%s6956_s1 + $0x750] sm:$0xff]  }
  0xb6   :  { %5129 = vmatprep.subr.bf16.mxu1 %v5459_v19  ;;  %v5519_v19 = vld [vmem:[%s6956_s1 + $0x7d0] sm:$0xff]  }
  0xb8   :  { %5108 = vmatpush3.bf16.msra.mxu0 %v5460_v20  ;;  %v5520_v20 = vld [vmem:[%s6956_s1 + $0x710] sm:$0xff]  }
  0xb9   :  { %5130 = vmatpush3.bf16.msra.mxu1 %v5461_v21  ;;  %5109 = vmatprep.subr.bf16.mxu0 %v5462_v22  ;;  %v5521_v21 = vld [vmem:[%s6956_s1 + $0x790] sm:$0xff]   ;;  %v5522_v22 = vld [vmem:[%s6956_s1 + $0x758] sm:$0xff]  }
  0xba   :  { %5131 = vmatprep.subr.bf16.mxu1 %v5463_v23  ;;  %v5523_v23 = vld [vmem:[%s6956_s1 + $0x7d8] sm:$0xff]  }
  0xbc   :  { %5110 = vmatpush3.bf16.msra.mxu0 %v5464_v24  ;;  %v5524_v24 = vld [vmem:[%s6956_s1 + $0x718] sm:$0xff]  }
  0xbd   :  { %5132 = vmatpush3.bf16.msra.mxu1 %v5465_v25  ;;  %5111 = vmatprep.subr.bf16.mxu0 %v5466_v26  ;;  %v5525_v25 = vld [vmem:[%s6956_s1 + $0x798] sm:$0xff]   ;;  %v5526_v26 = vld [vmem:[%s6956_s1 + $0x760] sm:$0xff]  }
  0xbe   :  { %5133 = vmatprep.subr.bf16.mxu1 %v5467_v27  ;;  %v5527_v27 = vld [vmem:[%s6956_s1 + $0x7e0] sm:$0xff]  }
  0xc0   :  { %5112 = vmatpush3.bf16.msra.mxu0 %v5468_v28  ;;  %v5528_v28 = vld [vmem:[%s6956_s1 + $0x720] sm:$0xff]  }
  0xc1   :  { %5134 = vmatpush3.bf16.msra.mxu1 %v5469_v29  ;;  %5141 = vmatprep.subr.bf16.mxu0 %v5474_v36 }
  0xc2   :  { %5163 = vmatprep.subr.bf16.mxu1 %v5475_v37  ;;  %v5530_v37 = vld [vmem:[%s6956_s1 + $0x768] sm:$0xff]  }
  0xc3   :  { %2644 = vmatmul.mubr.bf16.vlgmr.msra.gmra.mrb[20].mxu0 %v4478_v32  ;;  %v4457_v32 = vld [vmem:[%s6957_s2] ss:$0 sm:$0xff] }
  0xc4   :  { %2684 = vmatmul.mubr.bf16.vlgmr.msra.gmra.mrb[20].mxu1 %v4480_v34  ;;  %5142 = vmatpush3.bf16.msra.mxu0 %v5476_v38 }
  0xc5   :  { %5164 = vmatpush3.bf16.msra.mxu1 %v5477_v39  ;;  %5143 = vmatprep.subr.bf16.mxu0 %v5478_v40  ;;  %v5531_v39 = vld [vmem:[%s6956_s1 + $0x7e8] sm:$0xff]  }
  0xc6   :  { %5165 = vmatprep.subr.bf16.mxu1 %v5479_v41  ;;  %2723 = vmatprep.mubr.bf16.mxu0 %v4483_v7 }
  0xc7   :  { %2763 = vmatprep.mubr.bf16.mxu1 %v4485_v10 }
  0xc8   :  { %5144 = vmatpush3.bf16.msra.mxu0 %v5480_v42  ;;  %v5532_v42 = vld [vmem:[%s6956_s1 + $0x728] sm:$0xff]  }
  0xc9   :  { %5166 = vmatpush3.bf16.msra.mxu1 %v5481_v43  ;;  %5145 = vmatprep.subr.bf16.mxu0 %v5482_v44  ;;  %v5533_v44 = vld [vmem:[%s6956_s1 + $0x7a8] sm:$0xff]  }
  0xca   :  { %5167 = vmatprep.subr.bf16.mxu1 %v5483_v45 }
  0xcc   :  { %5146 = vmatpush3.bf16.msra.mxu0 %v5484_v46 }
  0xcd   :  { %5168 = vmatpush3.bf16.msra.mxu1 %v5485_v47  ;;  %5147 = vmatprep.subr.bf16.mxu0 %v5486_v48  ;;  %v5534_v47 = vld [vmem:[%s6956_s1 + $0x770] sm:$0xff]  }
  0xce   :  { %5169 = vmatprep.subr.bf16.mxu1 %v5487_v49  ;;  %v5535_v48 = vld [vmem:[%s6956_s1 + $0x7f0] sm:$0xff]  }
  0xcf   :  { %v5536_v49 = vld [vmem:[%s6956_s1 + $0x730] sm:$0xff]  }
  0xd0   :  { %5148 = vmatpush3.bf16.msra.mxu0 %v5488_v50  ;;  %v5537_v50 = vld [vmem:[%s6956_s1 + $0x7b0] sm:$0xff]  }
  0xd1   :  { %5170 = vmatpush3.bf16.msra.mxu1 %v5489_v51  ;;  %5149 = vmatprep.subr.bf16.mxu0 %v5490_v52  ;;  %v5538_v51 = vld [vmem:[%s6956_s1 + $0x778] sm:$0xff]  }
  0xd2   :  { %5171 = vmatprep.subr.bf16.mxu1 %v5491_v53  ;;  %v5539_v52 = vld [vmem:[%s6956_s1 + $0x7f8] sm:$0xff]  }
  0xd3   :  { %v5540_v53 = vld [vmem:[%s6956_s1 + $0x738] sm:$0xff]  }
  0xd4   :  { %5150 = vmatpush3.bf16.msra.mxu0 %v5492_v54  ;;  %v5541_v54 = vld [vmem:[%s6956_s1 + $0x7b8] sm:$0xff]  }
  0xd5   :  { %5172 = vmatpush3.bf16.msra.mxu1 %v5493_v55  ;;  %5151 = vmatprep.subr.bf16.mxu0 %v5494_v56  ;;  %v42_v55 = vld [vmem:[%s6955_s0 + $0x70] sm:$0xff]  ;;  %v43_v56 = vld [vmem:[%s6955_s0 + $0x78] sm:$0xff] }
  0xd6   :  { %5173 = vmatprep.subr.bf16.mxu1 %v5495_v57  ;;  %v4486_v57 = vcombine.low %v42_v55, %v42_v55 }
  0xd8   :  { %5152 = vmatpush3.bf16.msra.mxu0 %v5496_v58  ;;  %v4487_v58 = vcombine.high %v42_v55, %v42_v55 }
  0xd9   :  { %5174 = vmatpush3.bf16.msra.mxu1 %v5497_v59  ;;  %5153 = vmatprep.subr.bf16.mxu0 %v5498_v60  ;;  %v4488_v59 = vcombine.low %v43_v56, %v43_v56  ;;  %v4489_v60 = vcombine.high %v43_v56, %v43_v56 }
  0xda   :  { %5175 = vmatprep.subr.bf16.mxu1 %v5499_v61 }
  0xdc   :  { %5154 = vmatpush3.bf16.msra.mxu0 %v5500_v62 }
  0xdd   :  { %5176 = vmatpush3.bf16.msra.mxu1 %v5501_v63  ;;  %5155 = vmatprep.subr.bf16.mxu0 %v5502_v0 }
  0xde   :  { %5177 = vmatprep.subr.bf16.mxu1 %v5503_v1 }
  0xe0   :  { %5156 = vmatpush3.bf16.msra.mxu0 %v5504_v2 }
  0xe1   :  { %5178 = vmatpush3.bf16.msra.mxu1 %v5505_v3  ;;  %5185 = vmatprep.subr.bf16.mxu0 %v5510_v9 }
  0xe2   :  { %5207 = vmatprep.subr.bf16.mxu1 %v5511_v11 }
  0xe3   :  { %2724 = vmatmul.mubr.bf16.vlgmr.msra.gmra.mrb[24].mxu0 %v4482_v6 }
  0xe4   :  { %2764 = vmatmul.mubr.bf16.vlgmr.msra.gmra.mrb[24].mxu1 %v4484_v8  ;;  %5186 = vmatpush3.bf16.msra.mxu0 %v5512_v12 }
  0xe5   :  { %5208 = vmatpush3.bf16.msra.mxu1 %v5513_v13  ;;  %5187 = vmatprep.subr.bf16.mxu0 %v5514_v14 }
  0xe6   :  { %5209 = vmatprep.subr.bf16.mxu1 %v5515_v15 }
  0xe8   :  { %5188 = vmatpush3.bf16.msra.mxu0 %v5516_v16 }
  0xe9   :  { %5210 = vmatpush3.bf16.msra.mxu1 %v5517_v17  ;;  %5189 = vmatprep.subr.bf16.mxu0 %v5518_v18 }
  0xea   :  { %5211 = vmatprep.subr.bf16.mxu1 %v5519_v19 }
  0xec   :  { %5190 = vmatpush3.bf16.msra.mxu0 %v5520_v20 }
  0xed   :  { %5212 = vmatpush3.bf16.msra.mxu1 %v5521_v21  ;;  %5191 = vmatprep.subr.bf16.mxu0 %v5522_v22 }
  0xee   :  { %5213 = vmatprep.subr.bf16.mxu1 %v5523_v23 }
  0xf0   :  { %5192 = vmatpush3.bf16.msra.mxu0 %v5524_v24 }
  0xf1   :  { %5214 = vmatpush3.bf16.msra.mxu1 %v5525_v25  ;;  %5193 = vmatprep.subr.bf16.mxu0 %v5526_v26 }
  0xf2   :  { %5215 = vmatprep.subr.bf16.mxu1 %v5527_v27 }
  0xf4   :  { %5194 = vmatpush3.bf16.msra.mxu0 %v5528_v28 }
  0xf5   :  { %5216 = vmatpush3.bf16.msra.mxu1 %v5529_v30  ;;  %5195 = vmatprep.subr.bf16.mxu0 %v5530_v37 }
  0xf6   :  { %v4893_v29 = vpop.f32.mrb[0].mxu0  ;;  %5217 = vmatprep.subr.bf16.mxu1 %v5531_v39 }
  0xf7   :  { %v4915_v31 = vpop.f32.mrb[0].mxu1  ;;  %v4894_v33 = vpop.f32.mrb[1].mxu0 }
  0xf8   :  { %v4916_v34 = vpop.f32.mrb[1].mxu1  ;;  %v4895_v35 = vadd.f32 %v4894_v33, %v4893_v29  ;;  %v4896_v38 = vpop.f32.mrb[2].mxu0  ;;  %5196 = vmatpush3.bf16.msra.mxu0 %v5532_v42 }
  0xf9   :  { %v4917_v36 = vadd.f32 %v4916_v34, %v4915_v31  ;;  %v4918_v40 = vpop.f32.mrb[2].mxu1  ;;  %v4897_v43 = vpop.f32.mrb[3].mxu0  ;;  %5218 = vmatpush3.bf16.msra.mxu1 %v5533_v44  ;;  %5197 = vmatprep.subr.bf16.mxu0 %v5534_v47 }
  0xfa   :  { %v2246_v41 = vadd.f32 %v4895_v35, %v4457_v32  ;;  %v4919_v45 = vpop.f32.mrb[3].mxu1  ;;  %5219 = vmatprep.subr.bf16.mxu1 %v5535_v48 }
  0xfc   :  { %v2286_v46 = vadd.f32 %v4917_v36, %v2246_v41  ;;  %5198 = vmatpush3.bf16.msra.mxu0 %v5536_v49 }
  0xfd   :  { %5220 = vmatpush3.bf16.msra.mxu1 %v5537_v50  ;;  %5199 = vmatprep.subr.bf16.mxu0 %v5538_v51 }
  0xfe   :  { %5221 = vmatprep.subr.bf16.mxu1 %v5539_v52 }
 0x100   :  { %5200 = vmatpush3.bf16.msra.mxu0 %v5540_v53 }
 0x101   :  { %12 = vsyncpa [#allocation3], 0  ;;  %5222 = vmatpush3.bf16.msra.mxu1 %v5541_v54  ;;  %2803 = vmatprep.mubr.bf16.mxu0 %v4487_v58  ;;  %v2852_v32 = vld [vmem:[%s6958_s3] sm:$0xff]  ;;  %v2853_v33 = vld [vmem:[%s6958_s3 + $0x8] sm:$0xff]  ;;  %v5698_v36 = vmov 0.0|0.0   ;;  %vm2867_vm0 = vcmask 1045504  }
 0x102   :  { %2843 = vmatprep.mubr.bf16.mxu1 %v4489_v60  ;;  %v5246_v34 = vpack.c.bf16 %v2853_v33, %v2852_v32  ;;  %5245 = vmatprep.subr.bf16.mxu0 %v5698_v36  ;;  %v2854_v37 = vld [vmem:[%s6958_s3 + $0x10] sm:$0xff]  ;;  %v2855_v38 = vld [vmem:[%s6958_s3 + $0x18] sm:$0x3f]  ;;  %vm5699_vm1 = vmmov 1   ;;  %vm5700_vm3 = vmmov 0   ;;  %v5701_v40 = vmov 0.0  }
 0x103   :  { %2804 = vmatmul.mubr.bf16.vlgmr.msra.gmra.mrb[28].mxu0 %v4486_v57  ;;  %v5249_v39 = vpack.c.bf16 %v2855_v38, %v2854_v37  ;;  %vm5250_vm2 = vmpackc.low %vm2867_vm0, %vm5699_vm1  ;;  %v2943_v41 = vld [vmem:[%s6960_s5] sm:$0xff]  ;;  %v2944_v43 = vld [vmem:[%s6960_s5 + $0x8] sm:$0xff]  ;;  %vm2863_vm4 = vcmask 244736   ;;  %vm3466_vm5 = vcmask 1046528  }
 0x104   :  { %2844 = vmatmul.mubr.bf16.vlgmr.msra.gmra.mrb[28].mxu1 %v4488_v59  ;;  %5247 = vmatpush3.bf16.msra.mxu0 %v5246_v34  ;;  %v2959_v42 = vld [vmem:[%s6960_s5 + $0x80] sm:$0xff]  ;;  %v2992_v38 = vld [vmem:[%s6960_s5 + $0x188] sm:$0x77] }
 0x105   :  { %5248 = vmatprep.subr.bf16.mxu0 %v5698_v36  ;;  %5242 = vmatprep.mubr.msk.f32.mxu0 %vm5700_vm3, %v5701_v40  ;;  %v4749_v44 = vcombine.low %v2943_v41, %v2959_v42  ;;  %v4750_v45 = vcombine.high %v2943_v41, %v2959_v42  ;;  %v2975_v34 = vld [vmem:[%s6960_s5 + $0x100] sm:$0xff]  ;;  %v2976_v36 = vld [vmem:[%s6960_s5 + $0x108] sm:$0xff] }
 0x106   :  { %v4784_v40 = vcombine.high %v2976_v36, %v2992_v38  ;;  %v4783_v41 = vcombine.low %v2976_v36, %v2992_v38 }
 0x107   :  { %3563 = vmatprep.subr.bf16.mxu1 %v4750_v45  ;;  %v2961_v45 = vld [vmem:[%s6960_s5 + $0x90] sm:$0xff] }
 0x108   :  { %5251 = vmatpush3.bf16.msk.msra.mxu0 %vm5250_vm2, %v5249_v39  ;;  %3564 = vmatpush1.bf16.msra.mxu1 %v4749_v44  ;;  %v2945_v44 = vld [vmem:[%s6960_s5 + $0x10] sm:$0xff] }
 0x116   :  { %v4937_v61 = vpop.f32.mrb[4].mxu0 }
 0x117   :  { %v4959_v62 = vpop.f32.mrb[4].mxu1  ;;  %v4938_v63 = vpop.f32.mrb[5].mxu0 }
 0x118   :  { %v4960_v0 = vpop.f32.mrb[5].mxu1  ;;  %v4939_v1 = vadd.f32 %v4938_v63, %v4937_v61  ;;  %v4940_v3 = vpop.f32.mrb[6].mxu0 }
 0x119   :  { %v4961_v2 = vadd.f32 %v4960_v0, %v4959_v62  ;;  %v4962_v4 = vpop.f32.mrb[6].mxu1  ;;  %v4941_v5 = vpop.f32.mrb[7].mxu0 }
 0x11a   :  { %v4963_v6 = vpop.f32.mrb[7].mxu1  ;;  %v2326_v7 = vadd.f32 %v4939_v1, %v2286_v46  ;;  %v2960_v46 = vld [vmem:[%s6960_s5 + $0x88] sm:$0xff] }
 0x11b   :  { %v4751_v47 = vcombine.low %v2944_v43, %v2960_v46  ;;  %v4752_v48 = vcombine.high %v2944_v43, %v2960_v46  ;;  %v3474_v43 = vsel %vm3466_vm5, %v4783_v41, 0  ;;  %v2946_v46 = vld [vmem:[%s6960_s5 + $0x18] sm:$0xff]  ;;  %v2952_v41 = vld [vmem:[%s6960_s5 + $0x48] sm:$0xff] }
 0x11c   :  { %v2366_v8 = vadd.f32 %v4961_v2, %v2326_v7 }
 0x11d   :  { %3604 = vmatprep.subr.bf16.mxu0 %v4752_v48  ;;  %v4753_v48 = vcombine.low %v2945_v44, %v2961_v45 }
 0x136   :  { %v4981_v9 = vpop.f32.mrb[8].mxu0 }
 0x137   :  { %v5003_v10 = vpop.f32.mrb[8].mxu1  ;;  %v4982_v11 = vpop.f32.mrb[9].mxu0 }
 0x138   :  { %v4983_v12 = vadd.f32 %v4982_v11, %v4981_v9  ;;  %v5004_v13 = vpop.f32.mrb[9].mxu1  ;;  %v4984_v14 = vpop.f32.mrb[10].mxu0 }
 0x139   :  { %v5005_v15 = vadd.f32 %v5004_v13, %v5003_v10  ;;  %v5006_v16 = vpop.f32.mrb[10].mxu1  ;;  %v4985_v17 = vpop.f32.mrb[11].mxu0 }
 0x13a   :  { %v2406_v18 = vadd.f32 %v4983_v12, %v2366_v8  ;;  %v5007_v19 = vpop.f32.mrb[11].mxu1 }
 0x13c   :  { %v2446_v20 = vadd.f32 %v5005_v15, %v2406_v18 }
 0x156   :  { %v5025_v21 = vpop.f32.mrb[12].mxu0 }
 0x157   :  { %v5047_v22 = vpop.f32.mrb[12].mxu1  ;;  %v5026_v23 = vpop.f32.mrb[13].mxu0 }
 0x158   :  { %v5027_v24 = vadd.f32 %v5026_v23, %v5025_v21  ;;  %v5048_v25 = vpop.f32.mrb[13].mxu1  ;;  %v5028_v26 = vpop.f32.mrb[14].mxu0 }
 0x159   :  { %v5049_v27 = vadd.f32 %v5048_v25, %v5047_v22  ;;  %v5050_v28 = vpop.f32.mrb[14].mxu1  ;;  %v5029_v29 = vpop.f32.mrb[15].mxu0 }
 0x15a   :  { %v2486_v30 = vadd.f32 %v5027_v24, %v2446_v20  ;;  %v5051_v31 = vpop.f32.mrb[15].mxu1 }
 0x15c   :  { %v2526_v35 = vadd.f32 %v5049_v27, %v2486_v30 }
 0x176   :  { %v5069_v49 = vpop.f32.mrb[16].mxu0 }
 0x177   :  { %v5091_v50 = vpop.f32.mrb[16].mxu1  ;;  %v5070_v51 = vpop.f32.mrb[17].mxu0 }
 0x178   :  { %v5092_v52 = vpop.f32.mrb[17].mxu1  ;;  %v5071_v53 = vadd.f32 %v5070_v51, %v5069_v49  ;;  %v5072_v55 = vpop.f32.mrb[18].mxu0  ;;  %v4754_v49 = vcombine.high %v2945_v44, %v2961_v45 }
 0x179   :  { %v5093_v54 = vadd.f32 %v5092_v52, %v5091_v50  ;;  %v5094_v56 = vpop.f32.mrb[18].mxu1  ;;  %v5073_v57 = vpop.f32.mrb[19].mxu0  ;;  %v2962_v50 = vld [vmem:[%s6960_s5 + $0x98] sm:$0xff] }
 0x17a   :  { %v5095_v58 = vpop.f32.mrb[19].mxu1  ;;  %v2566_v59 = vadd.f32 %v5071_v53, %v2526_v35  ;;  %v2991_v35 = vld [vmem:[%s6960_s5 + $0x180] sm:$0x77]  ;;  %v4755_v51 = vcombine.low %v2946_v46, %v2962_v50  ;;  %v4756_v52 = vcombine.high %v2946_v46, %v2962_v50  ;;  %v2977_v57 = vld [vmem:[%s6960_s5 + $0x110] sm:$0xff]  ;;  %v2984_v50 = vld [vmem:[%s6960_s5 + $0x148] sm:$0xff] }
 0x17b   :  { %v4782_v37 = vcombine.high %v2975_v34, %v2991_v35  ;;  %v4781_v39 = vcombine.low %v2975_v34, %v2991_v35  ;;  %v4746_v53 = vld [vmem:[%s6959_s4] ss:$0 sm:$0xff]  ;;  %v2993_v58 = vld [vmem:[%s6960_s5 + $0x190] sm:$0x77] }
 0x17c   :  { %v2606_v60 = vadd.f32 %v5093_v54, %v2566_v59  ;;  %v2978_v59 = vld [vmem:[%s6960_s5 + $0x118] sm:$0xff] }
 0x17d   :  { %4813 = vmatprep.subr.msk.bf16.mxu1 %vm3466_vm5, %v4782_v37  ;;  %v3468_v42 = vsel %vm3466_vm5, %v4781_v39, 0  ;;  %v2951_v39 = vld [vmem:[%s6960_s5 + $0x40] sm:$0xff] }
 0x17e   :  { %3566 = vmatpush1.bf16.msra.mxu1 %v3468_v42  ;;  %v2968_v42 = vld [vmem:[%s6960_s5 + $0xc8] sm:$0xff] }
 0x17f   :  { %3645 = vmatprep.subr.bf16.mxu1 %v4754_v49  ;;  %v4768_v46 = vcombine.high %v2952_v41, %v2968_v42  ;;  %v2999_v49 = vld [vmem:[%s6960_s5 + $0x1c0] sm:$0x77] }
 0x196   :  { %v5113_v61 = vpop.f32.mrb[20].mxu0 }
 0x197   :  { %v5135_v62 = vpop.f32.mrb[20].mxu1  ;;  %v5114_v63 = vpop.f32.mrb[21].mxu0 }
 0x198   :  { %v5115_v0 = vadd.f32 %v5114_v63, %v5113_v61  ;;  %v5136_v1 = vpop.f32.mrb[21].mxu1  ;;  %v5116_v2 = vpop.f32.mrb[22].mxu0 }
 0x199   :  { %v5137_v3 = vadd.f32 %v5136_v1, %v5135_v62  ;;  %v5138_v4 = vpop.f32.mrb[22].mxu1  ;;  %v5117_v5 = vpop.f32.mrb[23].mxu0  ;;  %v4786_v62 = vcombine.high %v2977_v57, %v2993_v58  ;;  %v4785_v1 = vcombine.low %v2977_v57, %v2993_v58  ;;  %v2953_v58 = vld [vmem:[%s6960_s5 + $0x50] sm:$0xff] }
 0x19a   :  { %v2646_v6 = vadd.f32 %v5115_v0, %v2606_v60  ;;  %v5139_v7 = vpop.f32.mrb[23].mxu1  ;;  %v2994_v60 = vld [vmem:[%s6960_s5 + $0x198] sm:$0x77]  ;;  %v2963_v4 = vld [vmem:[%s6960_s5 + $0xa0] sm:$0xff]  ;;  %v2948_v5 = vld [vmem:[%s6960_s5 + $0x28] sm:$0xff] }
 0x19b   :  { %v4788_v0 = vcombine.high %v2978_v59, %v2994_v60  ;;  %v4787_v2 = vcombine.low %v2978_v59, %v2994_v60  ;;  %v3480_v7 = vsel %vm3466_vm5, %v4785_v1, 0  ;;  %v2969_v59 = vld [vmem:[%s6960_s5 + $0xd0] sm:$0xff]  ;;  %v2954_v60 = vld [vmem:[%s6960_s5 + $0x58] sm:$0xff] }
 0x19c   :  { %v2686_v8 = vadd.f32 %v5137_v3, %v2646_v6  ;;  %v2947_v3 = vld [vmem:[%s6960_s5 + $0x20] sm:$0xff]  ;;  %v2964_v6 = vld [vmem:[%s6960_s5 + $0xa8] sm:$0xff]  ;;  %v4770_v1 = vcombine.high %v2953_v58, %v2969_v59 }
 0x1b6   :  { %v5157_v9 = vpop.f32.mrb[24].mxu0 }
 0x1b7   :  { %v5179_v10 = vpop.f32.mrb[24].mxu1  ;;  %v5158_v11 = vpop.f32.mrb[25].mxu0 }
 0x1b8   :  { %v5159_v12 = vadd.f32 %v5158_v11, %v5157_v9  ;;  %v5180_v13 = vpop.f32.mrb[25].mxu1  ;;  %v5160_v14 = vpop.f32.mrb[26].mxu0  ;;  %v4758_v9 = vcombine.high %v2947_v3, %v2963_v4  ;;  %v2979_v11 = vld [vmem:[%s6960_s5 + $0x120] sm:$0xff] }
 0x1b9   :  { %v5181_v15 = vadd.f32 %v5180_v13, %v5179_v10  ;;  %v5182_v16 = vpop.f32.mrb[26].mxu1  ;;  %v5161_v17 = vpop.f32.mrb[27].mxu0  ;;  %v4760_v10 = vcombine.high %v2948_v5, %v2964_v6  ;;  %v2980_v13 = vld [vmem:[%s6960_s5 + $0x128] sm:$0xff] }
 0x1ba   :  { %v2726_v18 = vadd.f32 %v5159_v12, %v2686_v8  ;;  %v5183_v19 = vpop.f32.mrb[27].mxu1  ;;  %v3486_v8 = vsel %vm3466_vm5, %v4787_v2, 0  ;;  %v2995_v12 = vld [vmem:[%s6960_s5 + $0x1a0] sm:$0x77]  ;;  %v2996_v14 = vld [vmem:[%s6960_s5 + $0x1a8] sm:$0x77]  ;;  %v4759_v16 = vcombine.low %v2948_v5, %v2964_v6 }
 0x1bb   :  { %v4790_v17 = vcombine.high %v2979_v11, %v2995_v12  ;;  %v4789_v19 = vcombine.low %v2979_v11, %v2995_v12  ;;  %v2986_v5 = vld [vmem:[%s6960_s5 + $0x158] sm:$0xff] }
 0x1bc   :  { %v2766_v20 = vadd.f32 %v5181_v15, %v2726_v18  ;;  %v4757_v15 = vcombine.low %v2947_v3, %v2963_v4  ;;  %v4792_v18 = vcombine.high %v2980_v13, %v2996_v14  ;;  %v2985_v3 = vld [vmem:[%s6960_s5 + $0x150] sm:$0xff]  ;;  %v3002_v6 = vld [vmem:[%s6960_s5 + $0x1d8] sm:$0x77] }
 0x1bd   :  { %v3001_v4 = vld [vmem:[%s6960_s5 + $0x1d0] sm:$0x77]  ;;  %v4803_v12 = vcombine.low %v2986_v5, %v3002_v6 }
 0x1be   :  { %v4801_v11 = vcombine.low %v2985_v3, %v3001_v4 }
 0x1d6   :  { %v5201_v21 = vpop.f32.mrb[28].mxu0 }
 0x1d7   :  { %v5223_v22 = vpop.f32.mrb[28].mxu1  ;;  %v5202_v23 = vpop.f32.mrb[29].mxu0 }
 0x1d8   :  { %v5203_v24 = vadd.f32 %v5202_v23, %v5201_v21  ;;  %v5224_v25 = vpop.f32.mrb[29].mxu1  ;;  %v5204_v26 = vpop.f32.mrb[30].mxu0  ;;  %v2949_v21 = vld [vmem:[%s6960_s5 + $0x30] sm:$0xff]  ;;  %v2950_v23 = vld [vmem:[%s6960_s5 + $0x38] sm:$0xff] }
 0x1d9   :  { %v5225_v27 = vadd.f32 %v5224_v25, %v5223_v22  ;;  %v5226_v28 = vpop.f32.mrb[30].mxu1  ;;  %v5205_v29 = vpop.f32.mrb[31].mxu0  ;;  %v2965_v22 = vld [vmem:[%s6960_s5 + $0xb0] sm:$0xff]  ;;  %v3492_v25 = vsel %vm3466_vm5, %v4789_v19, 0 }
 0x1da   :  { %v2806_v30 = vadd.f32 %v5203_v24, %v2766_v20  ;;  %v5227_v31 = vpop.f32.mrb[31].mxu1  ;;  %v4791_v20 = vcombine.low %v2980_v13, %v2996_v14  ;;  %v2966_v24 = vld [vmem:[%s6960_s5 + $0xb8] sm:$0xff]  ;;  %v2981_v29 = vld [vmem:[%s6960_s5 + $0x130] sm:$0xff]  ;;  %v2955_v13 = vld [vmem:[%s6960_s5 + $0x60] sm:$0xff] }
 0x1db   :  { %v4764_v28 = vcombine.high %v2950_v23, %v2966_v24  ;;  %v2982_v31 = vld [vmem:[%s6960_s5 + $0x138] sm:$0xff]  ;;  %v4763_v34 = vcombine.low %v2950_v23, %v2966_v24  ;;  %v2971_v14 = vld [vmem:[%s6960_s5 + $0xe0] sm:$0xff]  ;;  %v2988_v23 = vld [vmem:[%s6960_s5 + $0x168] sm:$0xff] }
 0x1dc   :  { %v2846_v32 = vadd.f32 %v5225_v27, %v2806_v30  ;;  %v3498_v26 = vsel %vm3466_vm5, %v4791_v20, 0  ;;  %v4762_v27 = vcombine.high %v2949_v21, %v2965_v22  ;;  %v2997_v30 = vld [vmem:[%s6960_s5 + $0x1b0] sm:$0x77]  ;;  %v4774_v19 = vcombine.high %v2955_v13, %v2971_v14  ;;  %v3004_v24 = vld [vmem:[%s6960_s5 + $0x1e8] sm:$0x77] }
 0x1dd   :  { %v4794_v35 = vcombine.high %v2981_v29, %v2997_v30  ;;  %v4793_v37 = vcombine.low %v2981_v29, %v2997_v30  ;;  %v4807_v30 = vcombine.low %v2988_v23, %v3004_v24 }
 0x1de   :  { %v2851_v33 = vmax.f32 %v2846_v32, 0.0  ;;  %v2998_v32 = vld [vmem:[%s6960_s5 + $0x1b8] sm:$0x77] }
 0x1df   :  { %v4796_v36 = vcombine.high %v2982_v31, %v2998_v32  ;;  %v4795_v38 = vcombine.low %v2982_v31, %v2998_v32  ;;  %v2957_v31 = vld [vmem:[%s6960_s5 + $0x70] sm:$0xff] }
 0x1e0   :  { %5243 = vmatmul.mubr.msk.f32.vlgmr.msra.gmra.mrb[32].mxu0 %vm2863_vm4, %v2851_v33  ;;  %v4761_v33 = vcombine.low %v2949_v21, %v2965_v22  ;;  %v2987_v21 = vld [vmem:[%s6960_s5 + $0x160] sm:$0xff]  ;;  %v2973_v32 = vld [vmem:[%s6960_s5 + $0xf0] sm:$0xff] }
 0x1e1   :  { %3605 = vmatpush1.bf16.msra.mxu0 %v4751_v47  ;;  %v5702_v47 = vmov 0   ;;  %v3510_v44 = vsel %vm3466_vm5, %v4795_v38, 0  ;;  %v3003_v22 = vld [vmem:[%s6960_s5 + $0x1e0] sm:$0x77] }
 0x1e2   :  { %4815 = vmatprep.subr.msk.bf16.mxu0 %vm3466_vm5, %v4784_v40  ;;  %3595 = vmatprep.mubr.bf16.mxu1 %v5702_v47  ;;  %v2967_v40 = vld [vmem:[%s6960_s5 + $0xc0] sm:$0xff]  ;;  %v4805_v29 = vcombine.low %v2987_v21, %v3003_v22 }
 0x1e3   :  { %3636 = vmatprep.mubr.bf16.mxu0 %v5702_v47  ;;  %v4766_v45 = vcombine.high %v2951_v39, %v2967_v40 }
 0x1e5   :  { %3607 = vmatpush1.bf16.msra.mxu0 %v3474_v43  ;;  %v3504_v43 = vsel %vm3466_vm5, %v4793_v37, 0  ;;  %v4778_v37 = vcombine.high %v2957_v31, %v2973_v32 }
 0x1e6   :  { %3686 = vmatprep.subr.bf16.mxu0 %v4756_v52  ;;  %v4765_v52 = vcombine.low %v2951_v39, %v2967_v40  ;;  %v2989_v39 = vld [vmem:[%s6960_s5 + $0x170] sm:$0xff] }
 0x1e7   :  { %v3005_v40 = vld [vmem:[%s6960_s5 + $0x1f0] sm:$0x77] }
 0x2b3   :  { %v2937_v54 = vpop.f32.mrb[32].mxu0 }
 0x2b4   :  { %v2938_v55 = vadd.f32 %v4746_v53, %v2937_v54  ;;  %v5244_v56 = vpop.f32.mrb[33].mxu0  ;;  %v4767_v53 = vcombine.low %v2952_v41, %v2968_v42  ;;  %v2990_v41 = vld [vmem:[%s6960_s5 + $0x178] sm:$0xff] }
 0x2b5   :  { %v3006_v42 = vld [vmem:[%s6960_s5 + $0x1f8] sm:$0x77] }
 0x2b6   :  { %v2941_v61 = vmax.f32 %v2938_v55, 0.0 }
 0x2b8   :  { %v6633_v63 = vpack.c.bf16 %v2941_v61, %v2941_v61  ;;  %v2970_v61 = vld [vmem:[%s6960_s5 + $0xd8] sm:$0xff] }
 0x2b9   :  { %v4772_v2 = vcombine.high %v2954_v60, %v2970_v61 }
 0x2ba   :  { %4814 = vmatmul.mubr.msk.bf16.vlgmr.msra.gmra.mrb[32].mxu1 %vm2863_vm4, %v6633_v63  ;;  %4816 = vmatmul.mubr.msk.bf16.vlgmr.msra.gmra.mrb[36].mxu0 %vm2863_vm4, %v6633_v63 }
 0x2bb   :  { %3646 = vmatpush1.bf16.msra.mxu1 %v4753_v48  ;;  %3687 = vmatpush1.bf16.msra.mxu0 %v4755_v51  ;;  %v2983_v48 = vld [vmem:[%s6960_s5 + $0x140] sm:$0xff]  ;;  %v3000_v51 = vld [vmem:[%s6960_s5 + $0x1c8] sm:$0x77] }
 0x2bc   :  { %4817 = vmatprep.subr.msk.bf16.mxu1 %vm3466_vm5, %v4786_v62  ;;  %4819 = vmatprep.subr.msk.bf16.mxu0 %vm3466_vm5, %v4788_v0  ;;  %v4798_v54 = vcombine.high %v2983_v48, %v2999_v49  ;;  %v4800_v55 = vcombine.high %v2984_v50, %v3000_v51  ;;  %v4797_v56 = vcombine.low %v2983_v48, %v2999_v49 }
 0x2bd   :  { %3677 = vmatprep.mubr.bf16.mxu1 %v5702_v47  ;;  %3718 = vmatprep.mubr.bf16.mxu0 %v5702_v47  ;;  %v4799_v57 = vcombine.low %v2984_v50, %v3000_v51  ;;  %v4809_v48 = vcombine.low %v2989_v39, %v3005_v40  ;;  %v4811_v49 = vcombine.low %v2990_v41, %v3006_v42 }
 0x2be   :  { %v3516_v62 = vsel %vm3466_vm5, %v4797_v56, 0  ;;  %v3007_v56 = vld [vmem:[%s6961_s6] sm:$0xff] }
 0x2bf   :  { %3648 = vmatpush1.bf16.msra.mxu1 %v3480_v7  ;;  %3689 = vmatpush1.bf16.msra.mxu0 %v3486_v8  ;;  %v3522_v0 = vsel %vm3466_vm5, %v4799_v57, 0  ;;  %v4769_v7 = vcombine.low %v2953_v58, %v2969_v59  ;;  %v4771_v8 = vcombine.low %v2954_v60, %v2970_v61  ;;  %v3552_v50 = vsel %vm3466_vm5, %v4809_v48, 0 }
 0x2c0   :  { %3727 = vmatprep.subr.bf16.mxu1 %v4758_v9  ;;  %3768 = vmatprep.subr.bf16.mxu0 %v4760_v10  ;;  %v4802_v9 = vcombine.high %v2985_v3, %v3001_v4  ;;  %v4804_v10 = vcombine.high %v2986_v5, %v3002_v6  ;;  %v3558_v51 = vsel %vm3466_vm5, %v4811_v49, 0 }
 0x2c2   :  { %4818 = vmatmul.mubr.msk.bf16.vlgmr.msra.gmra.mrb[36].mxu1 %vm2863_vm4, %v6633_v63  ;;  %4820 = vmatmul.mubr.msk.bf16.vlgmr.msra.gmra.mrb[40].mxu0 %vm2863_vm4, %v6633_v63 }
 0x2c3   :  { %3728 = vmatpush1.bf16.msra.mxu1 %v4757_v15  ;;  %3769 = vmatpush1.bf16.msra.mxu0 %v4759_v16  ;;  %v2956_v15 = vld [vmem:[%s6960_s5 + $0x68] sm:$0xff] }
 0x2c4   :  { %4821 = vmatprep.subr.msk.bf16.mxu1 %vm3466_vm5, %v4790_v17  ;;  %4823 = vmatprep.subr.msk.bf16.mxu0 %vm3466_vm5, %v4792_v18  ;;  %v2972_v16 = vld [vmem:[%s6960_s5 + $0xe8] sm:$0xff]  ;;  %v3528_v17 = vsel %vm3466_vm5, %v4801_v11, 0  ;;  %v3534_v18 = vsel %vm3466_vm5, %v4803_v12, 0 }
 0x2c5   :  { %3759 = vmatprep.mubr.bf16.mxu1 %v5702_v47  ;;  %3800 = vmatprep.mubr.bf16.mxu0 %v5702_v47  ;;  %v4776_v20 = vcombine.high %v2956_v15, %v2972_v16 }
 0x2c7   :  { %3730 = vmatpush1.bf16.msra.mxu1 %v3492_v25  ;;  %3771 = vmatpush1.bf16.msra.mxu0 %v3498_v26  ;;  %v4773_v25 = vcombine.low %v2955_v13, %v2971_v14  ;;  %v4775_v26 = vcombine.low %v2956_v15, %v2972_v16 }
 0x2c8   :  { %3809 = vmatprep.subr.bf16.mxu1 %v4762_v27  ;;  %3850 = vmatprep.subr.bf16.mxu0 %v4764_v28  ;;  %v4806_v27 = vcombine.high %v2987_v21, %v3003_v22  ;;  %v4808_v28 = vcombine.high %v2988_v23, %v3004_v24 }
 0x2ca   :  { %4822 = vmatmul.mubr.msk.bf16.vlgmr.msra.gmra.mrb[40].mxu1 %vm2863_vm4, %v6633_v63  ;;  %4824 = vmatmul.mubr.msk.bf16.vlgmr.msra.gmra.mrb[44].mxu0 %vm2863_vm4, %v6633_v63 }
 0x2cb   :  { %3810 = vmatpush1.bf16.msra.mxu1 %v4761_v33  ;;  %3851 = vmatpush1.bf16.msra.mxu0 %v4763_v34  ;;  %v2958_v33 = vld [vmem:[%s6960_s5 + $0x78] sm:$0xff] }
 0x2cc   :  { %4825 = vmatprep.subr.msk.bf16.mxu1 %vm3466_vm5, %v4794_v35  ;;  %4827 = vmatprep.subr.msk.bf16.mxu0 %vm3466_vm5, %v4796_v36  ;;  %v2974_v34 = vld [vmem:[%s6960_s5 + $0xf8] sm:$0xff]  ;;  %v3540_v35 = vsel %vm3466_vm5, %v4805_v29, 0  ;;  %v3546_v36 = vsel %vm3466_vm5, %v4807_v30, 0 }
 0x2cd   :  { %3841 = vmatprep.mubr.bf16.mxu1 %v5702_v47  ;;  %3882 = vmatprep.mubr.bf16.mxu0 %v5702_v47  ;;  %v4780_v38 = vcombine.high %v2958_v33, %v2974_v34 }
 0x2cf   :  { %3812 = vmatpush1.bf16.msra.mxu1 %v3504_v43  ;;  %3853 = vmatpush1.bf16.msra.mxu0 %v3510_v44  ;;  %v4777_v43 = vcombine.low %v2957_v31, %v2973_v32  ;;  %v4779_v44 = vcombine.low %v2958_v33, %v2974_v34  ;;  %v6883_v32 = vld [vmem:[%s6961_s6 + $0x8] sm:$0xff] }
 0x2d0   :  { %3891 = vmatprep.subr.bf16.mxu1 %v4766_v45  ;;  %3932 = vmatprep.subr.bf16.mxu0 %v4768_v46  ;;  %v4810_v45 = vcombine.high %v2989_v39, %v3005_v40  ;;  %v4812_v46 = vcombine.high %v2990_v41, %v3006_v42 }
 0x2d2   :  { %4826 = vmatmul.mubr.msk.bf16.vlgmr.msra.gmra.mrb[44].mxu1 %vm2863_vm4, %v6633_v63  ;;  %4828 = vmatmul.mubr.msk.bf16.vlgmr.msra.gmra.mrb[48].mxu0 %vm2863_vm4, %v6633_v63 }
 0x2d3   :  { %3892 = vmatpush1.bf16.msra.mxu1 %v4765_v52  ;;  %3933 = vmatpush1.bf16.msra.mxu0 %v4767_v53  ;;  %v3015_v52 = vlaneseq }
 0x2d4   :  { %4829 = vmatprep.subr.msk.bf16.mxu1 %vm3466_vm5, %v4798_v54  ;;  %4831 = vmatprep.subr.msk.bf16.mxu0 %vm3466_vm5, %v4800_v55 }
 0x2d5   :  { %3923 = vmatprep.mubr.bf16.mxu1 %v5702_v47  ;;  %3964 = vmatprep.mubr.bf16.mxu0 %v5702_v47  ;;  %v3016_v53 = vshrl.u32 %v3015_v52, 7 }
 0x2d7   :  { %3894 = vmatpush1.bf16.msra.mxu1 %v3516_v62  ;;  %3935 = vmatpush1.bf16.msra.mxu0 %v3522_v0  ;;  %v6853_v54 = vsub.s32 0, %v3016_v53  ;;  %v6855_v55 = vsub.s32 2, %v3016_v53  ;;  %v6860_v57 = vsub.s32 1, %v3016_v53  ;;  %v6868_v4 = vsub.s32 4, %v3016_v53 }
 0x2d8   :  { %3973 = vmatprep.subr.bf16.mxu1 %v4770_v1  ;;  %4014 = vmatprep.subr.bf16.mxu0 %v4772_v2  ;;  %v6870_v5 = vsub.s32 6, %v3016_v53  ;;  %v6874_v11 = vsub.s32 7, %v3016_v53 }
 0x2d9   :  { %v3018_v58 = vrot.slane %v3007_v56, %v6853_v54  ;;  %v3026_v59 = vrot.slane %v3007_v56, %v6855_v55  ;;  %v3050_v39 = vrot.slane %v6883_v32, %v6853_v54  ;;  %v3058_v40 = vrot.slane %v6883_v32, %v6855_v55 }
 0x2da   :  { %4830 = vmatmul.mubr.msk.bf16.vlgmr.msra.gmra.mrb[48].mxu1 %vm2863_vm4, %v6633_v63  ;;  %4832 = vmatmul.mubr.msk.bf16.vlgmr.msra.gmra.mrb[52].mxu0 %vm2863_vm4, %v6633_v63  ;;  %v3046_v21 = vrot.slane %v3007_v56, %v6874_v11  ;;  %v3054_v41 = vrot.slane %v6883_v32, %v6860_v57 }
 0x2db   :  { %3974 = vmatpush1.bf16.msra.mxu1 %v4769_v7  ;;  %4015 = vmatpush1.bf16.msra.mxu0 %v4771_v8 }
 0x2dc   :  { %4833 = vmatprep.subr.msk.bf16.mxu1 %vm3466_vm5, %v4802_v9  ;;  %4835 = vmatprep.subr.msk.bf16.mxu0 %vm3466_vm5, %v4804_v10  ;;  %v6872_v10 = vsub.s32 5, %v3016_v53 }
 0x2dd   :  { %4005 = vmatprep.mubr.bf16.mxu1 %v5702_v47  ;;  %4046 = vmatprep.mubr.bf16.mxu0 %v5702_v47 }
 0x2df   :  { %3976 = vmatpush1.bf16.msra.mxu1 %v3528_v17  ;;  %4017 = vmatpush1.bf16.msra.mxu0 %v3534_v18  ;;  %v3034_v18 = vrot.slane %v3007_v56, %v6868_v4 }
 0x2e0   :  { %4055 = vmatprep.subr.bf16.mxu1 %v4774_v19  ;;  %4096 = vmatprep.subr.bf16.mxu0 %v4776_v20  ;;  %v3042_v19 = vrot.slane %v3007_v56, %v6870_v5  ;;  %v3038_v20 = vrot.slane %v3007_v56, %v6872_v10 }
 0x2e2   :  { %4834 = vmatmul.mubr.msk.bf16.vlgmr.msra.gmra.mrb[52].mxu1 %vm2863_vm4, %v6633_v63  ;;  %4836 = vmatmul.mubr.msk.bf16.vlgmr.msra.gmra.mrb[56].mxu0 %vm2863_vm4, %v6633_v63 }
 0x2e3   :  { %4056 = vmatpush1.bf16.msra.mxu1 %v4773_v25  ;;  %4097 = vmatpush1.bf16.msra.mxu0 %v4775_v26 }
 0x2e4   :  { %4837 = vmatprep.subr.msk.bf16.mxu1 %vm3466_vm5, %v4806_v27  ;;  %4839 = vmatprep.subr.msk.bf16.mxu0 %vm3466_vm5, %v4808_v28 }
 0x2e5   :  { %4087 = vmatprep.mubr.bf16.mxu1 %v5702_v47  ;;  %4128 = vmatprep.mubr.bf16.mxu0 %v5702_v47 }
 0x2e7   :  { %4058 = vmatpush1.bf16.msra.mxu1 %v3540_v35  ;;  %4099 = vmatpush1.bf16.msra.mxu0 %v3546_v36 }
 0x2e8   :  { %4137 = vmatprep.subr.bf16.mxu1 %v4778_v37  ;;  %4178 = vmatprep.subr.bf16.mxu0 %v4780_v38 }
 0x2ea   :  { %4838 = vmatmul.mubr.msk.bf16.vlgmr.msra.gmra.mrb[56].mxu1 %vm2863_vm4, %v6633_v63  ;;  %4840 = vmatmul.mubr.msk.bf16.vlgmr.msra.gmra.mrb[60].mxu0 %vm2863_vm4, %v6633_v63 }
 0x2eb   :  { %4138 = vmatpush1.bf16.msra.mxu1 %v4777_v43  ;;  %4179 = vmatpush1.bf16.msra.mxu0 %v4779_v44 }
 0x2ec   :  { %4841 = vmatprep.subr.msk.bf16.mxu1 %vm3466_vm5, %v4810_v45  ;;  %4843 = vmatprep.subr.msk.bf16.mxu0 %vm3466_vm5, %v4812_v46 }
 0x2ed   :  { %4169 = vmatprep.mubr.bf16.mxu1 %v5702_v47  ;;  %4210 = vmatprep.mubr.bf16.mxu0 %v5702_v47  ;;  %v6862_v47 = vsub.s32 3, %v3016_v53 }
 0x2ef   :  { %4140 = vmatpush1.bf16.msra.mxu1 %v3552_v50  ;;  %4181 = vmatpush1.bf16.msra.mxu0 %v3558_v51  ;;  %v3030_v60 = vrot.slane %v3007_v56, %v6862_v47  ;;  %v3062_v42 = vrot.slane %v6883_v32, %v6862_v47 }
 0x2f2   :  { %4842 = vmatmul.mubr.msk.bf16.vlgmr.msra.gmra.mrb[60].mxu1 %vm2863_vm4, %v6633_v63  ;;  %4844 = vmatmul.mubr.msk.bf16.vlgmr.msra.gmra.mrb[64].mxu0 %vm2863_vm4, %v6633_v63  ;;  %v3022_v63 = vrot.slane %v3007_v56, %v6860_v57 }
 0x38d   :  { %v3597_v61 = vpop.f32.mrb[32].mxu1  ;;  %v3638_v62 = vpop.f32.mrb[36].mxu0 }
 0x38e   :  { %v3598_v0 = vadd.f32 %v3597_v61, %v3018_v58  ;;  %v3639_v1 = vadd.f32 %v3638_v62, %v3026_v59  ;;  %v3599_v2 = vpop.f32.mrb[33].mxu1  ;;  %v3640_v3 = vpop.f32.mrb[37].mxu0 }
 0x38f   :  { %v3600_v6 = vadd.f32 %v3599_v2, %v3022_v63  ;;  %v3641_v7 = vadd.f32 %v3640_v3, %v3030_v60  ;;  %v3601_v8 = vpop.f32.mrb[34].mxu1  ;;  %v3642_v9 = vpop.f32.mrb[38].mxu0 }
 0x390   :  { %v4845_v12 = vmul.f32 -1.442695, %v3598_v0  ;;  %v4847_v13 = vmul.f32 -1.442695, %v3639_v1  ;;  %v3602_v14 = vpop.f32.mrb[35].mxu1  ;;  %v3643_v15 = vpop.f32.mrb[39].mxu0  ;;  %v3066_v9 = vrot.slane %v6883_v32, %v6868_v4 }
 0x391   :  { %v4846_v16 = vmul.f32 -1.442695, %v3600_v6  ;;  %v4848_v17 = vmul.f32 -1.442695, %v3641_v7  ;;  %v3078_v14 = vrot.slane %v6883_v32, %v6874_v11 }
 0x392   :  { %5546 = vpow2.f32 %v4845_v12  ;;  %v3074_v12 = vrot.slane %v6883_v32, %v6870_v5 }
 0x393   :  { %5548 = vpow2.f32 %v4847_v13  ;;  %v3070_v13 = vrot.slane %v6883_v32, %v6872_v10  ;;  %v6904_v32 = vld [vmem:[%s6961_s6 + $0x10] sm:$0xff] }
 0x394   :  { %5550 = vpow2.f32 %v4846_v16 }
 0x395   :  { %5552 = vpow2.f32 %v4848_v17  ;;  %v3679_v22 = vpop.f32.mrb[36].mxu1  ;;  %v3720_v23 = vpop.f32.mrb[40].mxu0 }
 0x396   :  { %v3680_v24 = vadd.f32 %v3679_v22, %v3034_v18  ;;  %v3721_v25 = vadd.f32 %v3720_v23, %v3042_v19  ;;  %v3681_v26 = vpop.f32.mrb[37].mxu1  ;;  %v3722_v27 = vpop.f32.mrb[41].mxu0 }
 0x397   :  { %v3682_v28 = vadd.f32 %v3681_v26, %v3038_v20  ;;  %v3723_v29 = vadd.f32 %v3722_v27, %v3046_v21  ;;  %v3683_v30 = vpop.f32.mrb[38].mxu1  ;;  %v3724_v31 = vpop.f32.mrb[42].mxu0 }
 0x398   :  { %v4849_v33 = vmul.f32 -1.442695, %v3680_v24  ;;  %v4851_v34 = vmul.f32 -1.442695, %v3721_v25  ;;  %v3684_v35 = vpop.f32.mrb[39].mxu1  ;;  %v3725_v36 = vpop.f32.mrb[43].mxu0 }
 0x399   :  { %v4850_v37 = vmul.f32 -1.442695, %v3682_v28  ;;  %v4852_v38 = vmul.f32 -1.442695, %v3723_v29 }
 0x39a   :  { %5554 = vpow2.f32 %v4849_v33 }
 0x39b   :  { %5556 = vpow2.f32 %v4851_v34 }
 0x39c   :  { %v5547_v43 = vpop.eup %5546  ;;  %5558 = vpow2.f32 %v4850_v37 }
 0x39d   :  { %v5549_v44 = vpop.eup %5548  ;;  %v4315_v45 = vadd.f32 1.0, %v5547_v43  ;;  %5560 = vpow2.f32 %v4852_v38  ;;  %v3761_v46 = vpop.f32.mrb[40].mxu1  ;;  %v3090_v43 = vrot.slane %v6904_v32, %v6855_v55 }
 0x39e   :  { %v3802_v48 = vpop.f32.mrb[44].mxu0  ;;  %v5551_v49 = vpop.eup %5550  ;;  %v4317_v50 = vadd.f32 1.0, %v5549_v44  ;;  %v3762_v51 = vadd.f32 %v3761_v46, %v3050_v39  ;;  %v3094_v46 = vrot.slane %v6904_v32, %v6862_v47 }
 0x39f   :  { %v3803_v52 = vadd.f32 %v3802_v48, %v3058_v40  ;;  %v3763_v53 = vpop.f32.mrb[41].mxu1  ;;  %v3804_v56 = vpop.f32.mrb[45].mxu0  ;;  %5562 = vrcp.f32 %v4315_v45  ;;  %v4316_v59 = vadd.f32 1.0, %v5551_v49  ;;  %v3086_v45 = vrot.slane %v6904_v32, %v6860_v57 }
 0x3a0   :  { %v5553_v58 = vpop.eup %5552  ;;  %v3764_v63 = vadd.f32 %v3763_v53, %v3054_v41  ;;  %v3805_v60 = vadd.f32 %v3804_v56, %v3062_v42  ;;  %v3765_v61 = vpop.f32.mrb[42].mxu1  ;;  %5564 = vrcp.f32 %v4317_v50  ;;  %v4853_v1 = vmul.f32 -1.442695, %v3762_v51 }
 0x3a1   :  { %v3806_v62 = vpop.f32.mrb[46].mxu0  ;;  %v4318_v0 = vadd.f32 1.0, %v5553_v58  ;;  %v4855_v2 = vmul.f32 -1.442695, %v3803_v52  ;;  %v3766_v3 = vpop.f32.mrb[43].mxu1  ;;  %5566 = vrcp.f32 %v4316_v59  ;;  %v3082_v42 = vrot.slane %v6904_v32, %v6853_v54 }
 0x3a2   :  { %v4854_v6 = vmul.f32 -1.442695, %v3764_v63  ;;  %v3807_v7 = vpop.f32.mrb[47].mxu0  ;;  %v4856_v8 = vmul.f32 -1.442695, %v3805_v60 }
 0x3a3   :  { %5568 = vrcp.f32 %v4318_v0 }
 0x3a4   :  { %5570 = vpow2.f32 %v4853_v1  ;;  %v5555_v15 = vpop.eup %5554 }
 0x3a5   :  { %5572 = vpow2.f32 %v4855_v2  ;;  %v5557_v16 = vpop.eup %5556  ;;  %v4319_v17 = vadd.f32 1.0, %v5555_v15  ;;  %v3843_v18 = vpop.f32.mrb[44].mxu1 }
 0x3a6   :  { %5574 = vpow2.f32 %v4854_v6  ;;  %v3884_v19 = vpop.f32.mrb[48].mxu0  ;;  %v5559_v20 = vpop.eup %5558  ;;  %v4321_v21 = vadd.f32 1.0, %v5557_v16  ;;  %v3844_v22 = vadd.f32 %v3843_v18, %v3066_v9  ;;  %v3106_v18 = vrot.slane %v6904_v32, %v6870_v5 }
 0x3a7   :  { %5576 = vpow2.f32 %v4856_v8  ;;  %v3885_v23 = vadd.f32 %v3884_v19, %v3074_v12  ;;  %v3845_v24 = vpop.f32.mrb[45].mxu1  ;;  %v3886_v25 = vpop.f32.mrb[49].mxu0  ;;  %v4320_v27 = vadd.f32 1.0, %v5559_v20 }
 0x3a8   :  { %v5561_v26 = vpop.eup %5560  ;;  %5578 = vrcp.f32 %v4319_v17  ;;  %v3846_v28 = vadd.f32 %v3845_v24, %v3070_v13  ;;  %v3887_v29 = vadd.f32 %v3886_v25, %v3078_v14  ;;  %v3847_v30 = vpop.f32.mrb[46].mxu1  ;;  %v4857_v34 = vmul.f32 -1.442695, %v3844_v22 }
 0x3a9   :  { %v3888_v31 = vpop.f32.mrb[50].mxu0  ;;  %5580 = vrcp.f32 %v4321_v21  ;;  %v4322_v33 = vadd.f32 1.0, %v5561_v26  ;;  %v4859_v35 = vmul.f32 -1.442695, %v3885_v23  ;;  %v3848_v36 = vpop.f32.mrb[47].mxu1  ;;  %v3098_v17 = vrot.slane %v6904_v32, %v6868_v4 }
 0x3aa   :  { %v5563_v37 = vpop.eup %5562  ;;  %5582 = vrcp.f32 %v4320_v27  ;;  %v4858_v38 = vmul.f32 -1.442695, %v3846_v28  ;;  %v3889_v39 = vpop.f32.mrb[51].mxu0  ;;  %v4860_v41 = vmul.f32 -1.442695, %v3887_v29  ;;  %v3102_v21 = vrot.slane %v6904_v32, %v6872_v10 }
 0x3ab   :  { %v5565_v40 = vpop.eup %5564  ;;  %4411 = vst [vmem:[#allocation2] sm:$0xff] %v5563_v37  ;;  %5584 = vrcp.f32 %v4322_v33  ;;  %v3110_v22 = vrot.slane %v6904_v32, %v6874_v11  ;;  %v6925_v39 = vld [vmem:[%s6961_s6 + $0x18] sm:$0xff]  ;;  %s5703_s6 = smov [#allocation2]  }
 0x3ac   :  { %v5567_v44 = vpop.eup %5566  ;;  %4413 = vst [vmem:[#allocation2 + $0x10] sm:$0xff] %v5565_v40  ;;  %5586 = vpow2.f32 %v4857_v34  ;;  %s4449_s20 = sshll.u32 %s5703_s6, 4  ;;  %s4450_s20 = int_to_ptr.vmem [resolvable:$true] %s4449_s20 }
 0x3ad   :  { %v5569_v48 = vpop.eup %5568  ;;  %4412 = vst [vmem:[#allocation2 + $0x8] sm:$0xff] %v5567_v44  ;;  %5588 = vpow2.f32 %v4859_v35  ;;  %v3925_v50 = vpop.f32.mrb[48].mxu1  ;;  %s5674_s21 = scalar_lea.vmem %s4450_s20, 4096  ;;  %p5679_p1 = scmp.lt.s32.totalorder %s4450_s20, %s4450_s20 }
 0x3ae   :  { %v5571_v49 = vpop.eup %5570  ;;  %4414 = vst [vmem:[#allocation2 + $0x18] sm:$0xff] %v5569_v48  ;;  %5590 = vpow2.f32 %v4858_v38  ;;  %v3966_v51 = vpop.f32.mrb[52].mxu0  ;;  %v3926_v56 = vadd.f32 %v3925_v50, %v3082_v42  ;;  %v3114_v50 = vrot.slane %v6925_v39, %v6853_v54  ;;  %p5675_p0 = scmp.ne.s32.totalorder %s4450_s20, %s5674_s21  ;;  %p5680_p2 = scmp.lt.s32.totalorder %s5674_s21, %s5674_s21 }
 0x3af   :  { %v5573_v52 = vpop.eup %5572  ;;  %v4323_v53 = vadd.f32 1.0, %v5571_v49  ;;  %5592 = vpow2.f32 %v4860_v41  ;;  %v3967_v58 = vadd.f32 %v3966_v51, %v3090_v43  ;;  %v3927_v59 = vpop.f32.mrb[49].mxu1  ;;  %v3122_v51 = vrot.slane %v6925_v39, %v6855_v55 }
 0x3b0   :  { %v3968_v63 = vpop.f32.mrb[53].mxu0  ;;  %v5575_v60 = vpop.eup %5574  ;;  %v4325_v61 = vadd.f32 1.0, %v5573_v52  ;;  %v3928_v62 = vadd.f32 %v3927_v59, %v3086_v45  ;;  %v4861_v7 = vmul.f32 -1.442695, %v3926_v56  ;;  %v3118_v56 = vrot.slane %v6925_v39, %v6860_v57  ;;  %p5681_p3 = por %p5680_p2, %p5679_p1 }
 0x3b1   :  { %v3969_v0 = vadd.f32 %v3968_v63, %v3094_v46  ;;  %v3929_v1 = vpop.f32.mrb[50].mxu1  ;;  %v3970_v2 = vpop.f32.mrb[54].mxu0  ;;  %5594 = vrcp.f32 %v4323_v53  ;;  %v4324_v6 = vadd.f32 1.0, %v5575_v60  ;;  %v4863_v13 = vmul.f32 -1.442695, %v3967_v58 }
 0x3b2   :  { %v5577_v3 = vpop.eup %5576  ;;  %v3930_v8 = vpop.f32.mrb[51].mxu1  ;;  %5596 = vrcp.f32 %v4325_v61  ;;  %v4862_v16 = vmul.f32 -1.442695, %v3928_v62  ;;  %v3126_v59 = vrot.slane %v6925_v39, %v6862_v47  ;;  %p5682_p4 = pnand %p5681_p3, %p5675_p0 }
 0x3b3   :  { %v5579_v9 = vpop.eup %5578  ;;  %v4326_v12 = vadd.f32 1.0, %v5577_v3  ;;  %v3971_v14 = vpop.f32.mrb[55].mxu0  ;;  %5598 = vrcp.f32 %v4324_v6  ;;  %v4864_v20 = vmul.f32 -1.442695, %v3969_v0 }
 0x3b4   :  { %v5581_v15 = vpop.eup %5580  ;;  %4415 = vst [vmem:[#allocation2 + $0x20] sm:$0xff] %v5579_v9 }
 0x3b5   :  { %v5583_v19 = vpop.eup %5582  ;;  %4417 = vst [vmem:[#allocation2 + $0x30] sm:$0xff] %v5581_v15  ;;  %5600 = vrcp.f32 %v4326_v12  ;;  %v4007_v25 = vpop.f32.mrb[52].mxu1 }
 0x3b6   :  { %v5585_v23 = vpop.eup %5584  ;;  %4416 = vst [vmem:[#allocation2 + $0x28] sm:$0xff] %v5583_v19  ;;  %5602 = vpow2.f32 %v4861_v7  ;;  %v4048_v26 = vpop.f32.mrb[56].mxu0  ;;  %v4008_v29 = vadd.f32 %v4007_v25, %v3098_v17  ;;  %v3130_v17 = vrot.slane %v6925_v39, %v6868_v4  ;;  %v3142_v4 = vrot.slane %v6925_v39, %v6874_v11 }
 0x3b7   :  { %v5587_v24 = vpop.eup %5586  ;;  %4418 = vst [vmem:[#allocation2 + $0x38] sm:$0xff] %v5585_v23  ;;  %5604 = vpow2.f32 %v4863_v13  ;;  %v4049_v30 = vadd.f32 %v4048_v26, %v3106_v18  ;;  %v4009_v31 = vpop.f32.mrb[53].mxu1 }
 0x3b8   :  { %v5589_v27 = vpop.eup %5588  ;;  %v4327_v28 = vadd.f32 1.0, %v5587_v24  ;;  %5606 = vpow2.f32 %v4862_v16  ;;  %v4050_v33 = vpop.f32.mrb[57].mxu0  ;;  %v4010_v36 = vadd.f32 %v4009_v31, %v3102_v21  ;;  %v4865_v42 = vmul.f32 -1.442695, %v4008_v29 }
 0x3b9   :  { %v5591_v34 = vpop.eup %5590  ;;  %v4329_v35 = vadd.f32 1.0, %v5589_v27  ;;  %5608 = vpow2.f32 %v4864_v20  ;;  %v4051_v32 = vadd.f32 %v4050_v33, %v3110_v22  ;;  %v4011_v37 = vpop.f32.mrb[54].mxu1  ;;  %v4867_v45 = vmul.f32 -1.442695, %v4049_v30 }
 0x3ba   :  { %v4052_v38 = vpop.f32.mrb[58].mxu0  ;;  %v5593_v40 = vpop.eup %5592  ;;  %5610 = vrcp.f32 %v4327_v28  ;;  %v4328_v41 = vadd.f32 1.0, %v5591_v34  ;;  %v4866_v49 = vmul.f32 -1.442695, %v4010_v36  ;;  %v3138_v21 = vrot.slane %v6925_v39, %v6870_v5 }
 0x3bb   :  { %v4012_v43 = vpop.f32.mrb[55].mxu1  ;;  %5612 = vrcp.f32 %v4329_v35  ;;  %v4330_v44 = vadd.f32 1.0, %v5593_v40  ;;  %v4053_v46 = vpop.f32.mrb[59].mxu0  ;;  %v4868_v53 = vmul.f32 -1.442695, %v4051_v32  ;;  %v3134_v24 = vrot.slane %v6925_v39, %v6872_v10 }
 0x3bc   :  { %v5595_v48 = vpop.eup %5594  ;;  %5614 = vrcp.f32 %v4328_v41 }
 0x3bd   :  { %v5597_v52 = vpop.eup %5596  ;;  %4419 = vst [vmem:[#allocation2 + $0x40] sm:$0xff] %v5595_v48  ;;  %5616 = vrcp.f32 %v4330_v44  ;;  %v4089_v54 = vpop.f32.mrb[56].mxu1 }
 0x3be   :  { %v5599_v58 = vpop.eup %5598  ;;  %4421 = vst [vmem:[#allocation2 + $0x50] sm:$0xff] %v5597_v52  ;;  %5618 = vpow2.f32 %v4865_v42  ;;  %v4130_v60 = vpop.f32.mrb[60].mxu0  ;;  %v4090_v55 = vadd.f32 %v4089_v54, %v3114_v50 }
 0x3bf   :  { %v5601_v63 = vpop.eup %5600  ;;  %4420 = vst [vmem:[#allocation2 + $0x48] sm:$0xff] %v5599_v58  ;;  %5620 = vpow2.f32 %v4867_v45  ;;  %v4131_v62 = vadd.f32 %v4130_v60, %v3122_v51  ;;  %v4091_v0 = vpop.f32.mrb[57].mxu1 }
 0x3c0   :  { %v5603_v61 = vpop.eup %5602  ;;  %4422 = vst [vmem:[#allocation2 + $0x58] sm:$0xff] %v5601_v63  ;;  %5622 = vpow2.f32 %v4866_v49  ;;  %v4132_v1 = vpop.f32.mrb[61].mxu0  ;;  %v4092_v3 = vadd.f32 %v4091_v0, %v3118_v56  ;;  %v4869_v15 = vmul.f32 -1.442695, %v4090_v55 }
 0x3c1   :  { %v5605_v2 = vpop.eup %5604  ;;  %v4331_v57 = vadd.f32 1.0, %v5603_v61  ;;  %5624 = vpow2.f32 %v4868_v53  ;;  %v4093_v6 = vpop.f32.mrb[58].mxu1  ;;  %v4133_v9 = vadd.f32 %v4132_v1, %v3126_v59  ;;  %v4871_v20 = vmul.f32 -1.442695, %v4131_v62 }
 0x3c2   :  { %v4134_v7 = vpop.f32.mrb[62].mxu0  ;;  %v5607_v8 = vpop.eup %5606  ;;  %v4333_v47 = vadd.f32 1.0, %v5605_v2  ;;  %v4870_v23 = vmul.f32 -1.442695, %v4092_v3 }
 0x3c3   :  { %v4094_v12 = vpop.f32.mrb[59].mxu1  ;;  %v5609_v13 = vpop.eup %5608  ;;  %5626 = vrcp.f32 %v4331_v57  ;;  %v4332_v14 = vadd.f32 1.0, %v5607_v8  ;;  %v4872_v26 = vmul.f32 -1.442695, %v4133_v9 }
 0x3c4   :  { %v4135_v16 = vpop.f32.mrb[63].mxu0  ;;  %v5611_v18 = vpop.eup %5610  ;;  %5628 = vrcp.f32 %v4333_v47  ;;  %v4334_v19 = vadd.f32 1.0, %v5609_v13 }
 0x3c5   :  { %v5613_v22 = vpop.eup %5612  ;;  %4423 = vst [vmem:[#allocation2 + $0x60] sm:$0xff] %v5611_v18  ;;  %5630 = vrcp.f32 %v4332_v14  ;;  %v4171_v28 = vpop.f32.mrb[60].mxu1 }
 0x3c6   :  { %v5615_v25 = vpop.eup %5614  ;;  %4425 = vst [vmem:[#allocation2 + $0x70] sm:$0xff] %v5613_v22  ;;  %5632 = vrcp.f32 %v4334_v19  ;;  %v4212_v29 = vpop.f32.mrb[64].mxu0  ;;  %v4172_v30 = vadd.f32 %v4171_v28, %v3130_v17 }
 0x3c7   :  { %v5617_v27 = vpop.eup %5616  ;;  %4424 = vst [vmem:[#allocation2 + $0x68] sm:$0xff] %v5615_v25  ;;  %5634 = vpow2.f32 %v4869_v15  ;;  %v4213_v31 = vadd.f32 %v4212_v29, %v3138_v21  ;;  %v4173_v33 = vpop.f32.mrb[61].mxu1 }
 0x3c8   :  { %v5619_v5 = vpop.eup %5618  ;;  %4426 = vst [vmem:[#allocation2 + $0x78] sm:$0xff] %v5617_v27  ;;  %5636 = vpow2.f32 %v4871_v20  ;;  %v4214_v34 = vpop.f32.mrb[65].mxu0  ;;  %v4174_v36 = vadd.f32 %v4173_v33, %v3134_v24  ;;  %v4873_v43 = vmul.f32 -1.442695, %v4172_v30 }
 0x3c9   :  { %v5621_v10 = vpop.eup %5620  ;;  %v4335_v35 = vadd.f32 1.0, %v5619_v5  ;;  %5638 = vpow2.f32 %v4870_v23  ;;  %v4175_v32 = vpop.f32.mrb[62].mxu1  ;;  %v4215_v39 = vadd.f32 %v4214_v34, %v3142_v4  ;;  %v4875_v46 = vmul.f32 -1.442695, %v4213_v31 }
 0x3ca   :  { %v4216_v37 = vpop.f32.mrb[66].mxu0  ;;  %v5623_v38 = vpop.eup %5622  ;;  %v4337_v11 = vadd.f32 1.0, %v5621_v10  ;;  %5640 = vpow2.f32 %v4872_v26  ;;  %v4874_v49 = vmul.f32 -1.442695, %v4174_v36 }
 0x3cb   :  { %v4176_v40 = vpop.f32.mrb[63].mxu1  ;;  %v5625_v41 = vpop.eup %5624  ;;  %5642 = vrcp.f32 %v4335_v35  ;;  %v4336_v42 = vadd.f32 1.0, %v5623_v38  ;;  %v4876_v51 = vmul.f32 -1.442695, %v4215_v39 }
 0x3cc   :  { %v4217_v44 = vpop.f32.mrb[67].mxu0  ;;  %5644 = vrcp.f32 %v4337_v11  ;;  %v4338_v45 = vadd.f32 1.0, %v5625_v41 }
 0x3cd   :  { %v5627_v48 = vpop.eup %5626  ;;  %5646 = vrcp.f32 %v4336_v42 }
 0x3ce   :  { %v5629_v50 = vpop.eup %5628  ;;  %4427 = vst [vmem:[#allocation2 + $0x80] sm:$0xff] %v5627_v48  ;;  %5648 = vrcp.f32 %v4338_v45 }
 0x3cf   :  { %v5631_v52 = vpop.eup %5630  ;;  %4429 = vst [vmem:[#allocation2 + $0x90] sm:$0xff] %v5629_v50  ;;  %5650 = vpow2.f32 %v4873_v43 }
 0x3d0   :  { %v5633_v53 = vpop.eup %5632  ;;  %4428 = vst [vmem:[#allocation2 + $0x88] sm:$0xff] %v5631_v52  ;;  %5652 = vpow2.f32 %v4875_v46 }
 0x3d1   :  { %v5635_v56 = vpop.eup %5634  ;;  %4430 = vst [vmem:[#allocation2 + $0x98] sm:$0xff] %v5633_v53  ;;  %5654 = vpow2.f32 %v4874_v49 }
 0x3d2   :  { %v5637_v58 = vpop.eup %5636  ;;  %v4339_v59 = vadd.f32 1.0, %v5635_v56  ;;  %5656 = vpow2.f32 %v4876_v51 }
 0x3d3   :  { %v5639_v63 = vpop.eup %5638  ;;  %v4341_v54 = vadd.f32 1.0, %v5637_v58 }
 0x3d4   :  { %v5641_v60 = vpop.eup %5640  ;;  %5658 = vrcp.f32 %v4339_v59  ;;  %v4340_v61 = vadd.f32 1.0, %v5639_v63 }
 0x3d5   :  { %v5643_v55 = vpop.eup %5642  ;;  %5660 = vrcp.f32 %v4341_v54  ;;  %v4342_v62 = vadd.f32 1.0, %v5641_v60 }
 0x3d6   :  { %v5645_v0 = vpop.eup %5644  ;;  %4431 = vst [vmem:[#allocation2 + $0xa0] sm:$0xff] %v5643_v55  ;;  %5662 = vrcp.f32 %v4340_v61 }
 0x3d7   :  { %v5647_v1 = vpop.eup %5646  ;;  %4433 = vst [vmem:[#allocation2 + $0xb0] sm:$0xff] %v5645_v0  ;;  %5664 = vrcp.f32 %v4342_v62 }
 0x3d8   :  { %v5649_v2 = vpop.eup %5648  ;;  %4432 = vst [vmem:[#allocation2 + $0xa8] sm:$0xff] %v5647_v1 }
 0x3d9   :  { %v5651_v57 = vpop.eup %5650  ;;  %4434 = vst [vmem:[#allocation2 + $0xb8] sm:$0xff] %v5649_v2 }
 0x3da   :  { %v5653_v3 = vpop.eup %5652  ;;  %v4343_v6 = vadd.f32 1.0, %v5651_v57 }
 0x3db   :  { %v5655_v7 = vpop.eup %5654  ;;  %v4345_v8 = vadd.f32 1.0, %v5653_v3 }
 0x3dc   :  { %v5657_v47 = vpop.eup %5656  ;;  %5666 = vrcp.f32 %v4343_v6  ;;  %v4344_v9 = vadd.f32 1.0, %v5655_v7 }
 0x3dd   :  { %5668 = vrcp.f32 %v4345_v8  ;;  %v4346_v12 = vadd.f32 1.0, %v5657_v47 }
 0x3de   :  { %v5659_v13 = vpop.eup %5658  ;;  %5670 = vrcp.f32 %v4344_v9 }
 0x3df   :  { %v5661_v14 = vpop.eup %5660  ;;  %4435 = vst [vmem:[#allocation2 + $0xc0] sm:$0xff] %v5659_v13  ;;  %5672 = vrcp.f32 %v4346_v12 }
 0x3e0   :  { %v5663_v15 = vpop.eup %5662  ;;  %4437 = vst [vmem:[#allocation2 + $0xd0] sm:$0xff] %v5661_v14 }
 0x3e1   :  { %v5665_v16 = vpop.eup %5664  ;;  %4436 = vst [vmem:[#allocation2 + $0xc8] sm:$0xff] %v5663_v15 }
 0x3e2   :  { %4438 = vst [vmem:[#allocation2 + $0xd8] sm:$0xff] %v5665_v16 }
 0x3e6   :  { %v5667_v17 = vpop.eup %5666 }
 0x3e7   :  { %v5669_v18 = vpop.eup %5668  ;;  %4439 = vst [vmem:[#allocation2 + $0xe0] sm:$0xff] %v5667_v17 }
 0x3e8   :  { %v5671_v19 = vpop.eup %5670  ;;  %4441 = vst [vmem:[#allocation2 + $0xf0] sm:$0xff] %v5669_v18 }
 0x3e9   :  { %v5673_v20 = vpop.eup %5672  ;;  %4440 = vst [vmem:[#allocation2 + $0xe8] sm:$0xff] %v5671_v19 }
 0x3ea   :  { %4442 = vst [vmem:[#allocation2 + $0xf8] sm:$0xff] %v5673_v20 }
 0x3eb   :  { %5685 = shalt.err (!%p5682_p4)
}
 0x3ec   :  { %s5686_s24 = scalar_lea.hbm %s6962_s7, 4096 }
 0x3ed   :  { %p5687_p5 = scmp.ne.s32.totalorder %s6962_s7, %s5686_s24  ;;  %p5690_p6 = scmp.lt.u32.totalorder %s5686_s24, %s6962_s7 }
 0x3ef   :  { %p5692_p7 = pnand %p5690_p6, %p5687_p5 }
 0x3f1   :  { %5695 = shalt.err (!%p5692_p7)
}
 0x3f2   :  { %4452 = dma.vmem_to_hbm [thread:$0]  %s4450_s20, 4096, %s6962_s7, [#allocation3]  }
 0x3f3   :  { %5696 = dma.done.wait [#allocation3], 4096  }
 0x3f4   :  { %5697 = vsyncadd [#allocation3], 4294963200 }
 0x3f5   :  { %4456 = vsyncpa [#allocation3], 1 }

</bundles_post_ra>
